<compile_context>
chip_gen: v6e
topology: v6e:2x2x1
jax: 0.10.0
libtpu: 0.0.40
codegen_flags: <defaults>
</compile_context>

<pallas_src>
import math

import jax
import jax.numpy as jnp
from jax.experimental import pallas as pl
from jax.experimental.pallas import tpu as pltpu

LOG_SIG_MIN = -20.0
LOG_SIG_MAX = 2.0
LANE = 128
HALF_LOG_2PI = 0.5 * math.log(2.0 * math.pi)
LOG2 = math.log(2.0)


def _round_up(x, m):
    return (x + m - 1) // m * m


# --------------------------------------------------------------------------
# Kernel: one TM-row tile of the TanhGaussian policy forward pass.
# --------------------------------------------------------------------------
def _tanh_gaussian_policy_kernel(
    obs_ref, z_ref, eps_ref,                      # streamed per-row inputs
    w1o_ref, w1z_ref, b1_ref, w2_ref, b2_ref,     # resident weights (bf16/f32)
    wh_ref, bh_ref,                               # fused mean|log_std head
    out_ref,                                      # (TM, 5*A) bf16 payload slab
    lp_ref,                                       # (TM, 1)   f32 log_prob
):
    # ---- MLP trunk: bf16 operands, f32 accumulation on the MXU ----
    h1 = (jnp.dot(obs_ref[...], w1o_ref[...], preferred_element_type=jnp.float32)
          + jnp.dot(z_ref[...], w1z_ref[...], preferred_element_type=jnp.float32)
          + b1_ref[...])
    h1 = jnp.maximum(h1, 0.0)

    h2 = jnp.dot(h1.astype(w2_ref.dtype), w2_ref[...],
                 preferred_element_type=jnp.float32) + b2_ref[...]
    h2 = jnp.maximum(h2, 0.0)

    # fused head: lanes [0:A) = mean, [A:2A) = log_std, rest zero-padded
    head = jnp.dot(h2.astype(wh_ref.dtype), wh_ref[...],
                   preferred_element_type=jnp.float32) + bh_ref[...]

    a_dim = eps_ref.shape[1]
    eps = eps_ref[...]
    mean = head[:, 0:a_dim]
    log_std = jnp.clip(head[:, a_dim:2 * a_dim], LOG_SIG_MIN, LOG_SIG_MAX)
    std = jnp.exp(log_std)

    # reparameterized sample through tanh
    pre_tanh = mean + std * eps
    action = jnp.tanh(pre_tanh)

    # Normal(mean, std).log_prob(pre_tanh): since pre_tanh - mean == std*eps,
    # the quadratic term is exactly -0.5*eps^2 (no divide needed).
    normal_lp = -0.5 * (eps * eps) - log_std - HALF_LOG_2PI
    # Stable tanh correction (EUP work): log(1 - tanh(x)^2)
    #   = 2*(log 2 - x - softplus(-2x)),  softplus(y) = max(y,0)+log(1+e^-|y|).
    neg2p = -2.0 * pre_tanh
    softplus = jnp.maximum(neg2p, 0.0) + jnp.log(1.0 + jnp.exp(-jnp.abs(neg2p)))
    log1m_tanh_sq = 2.0 * (LOG2 - pre_tanh - softplus)
    lp = normal_lp - log1m_tanh_sq
    lp_ref[...] = jnp.sum(lp, axis=1, keepdims=True)        # (TM, 1) f32

    # ---- narrow lane-dense payload slab via direct sub-slice stores ----
    dt = out_ref.dtype
    out_ref[:, 0 * a_dim:1 * a_dim] = action.astype(dt)
    out_ref[:, 1 * a_dim:2 * a_dim] = mean.astype(dt)
    out_ref[:, 2 * a_dim:3 * a_dim] = log_std.astype(dt)
    out_ref[:, 3 * a_dim:4 * a_dim] = std.astype(dt)
    out_ref[:, 4 * a_dim:5 * a_dim] = pre_tanh.astype(dt)


# --------------------------------------------------------------------------
# Wrapper-side parameter packing: split W1, fuse heads, zero-pad to 128 lanes,
# cast matmul operands to bf16 (biases stay f32). Pure layout plumbing.
# --------------------------------------------------------------------------
def _pack_policy_params(params, obs_dim, latent_dim):
    w1, b1, w2, b2, wm, bm, ws, bs = params
    hidden = w1.shape[1]
    action_dim = wm.shape[1]
    hidden_p = _round_up(hidden, LANE)
    head_p = _round_up(2 * action_dim, LANE)

    # layer 1 split (obs part / z part) so we never materialize cat([obs, z])
    w1o = jnp.zeros((obs_dim, hidden_p), jnp.float32).at[:, :hidden].set(w1[:obs_dim])
    w1z = jnp.zeros((latent_dim, hidden_p), jnp.float32).at[:, :hidden].set(w1[obs_dim:])
    b1p = jnp.zeros((1, hidden_p), jnp.float32).at[:, :hidden].set(b1)

    # layer 2, zero-padded hidden dim (padded units are exact zeros after ReLU)
    w2p = jnp.zeros((hidden_p, hidden_p), jnp.float32).at[:hidden, :hidden].set(w2)
    b2p = jnp.zeros((1, hidden_p), jnp.float32).at[:, :hidden].set(b2)

    # fused mean/log_std head, padded to a full 128-lane MXU tile
    wh = jnp.zeros((hidden_p, head_p), jnp.float32)
    wh = wh.at[:hidden, :action_dim].set(wm)
    wh = wh.at[:hidden, action_dim:2 * action_dim].set(ws)
    bh = jnp.zeros((1, head_p), jnp.float32)
    bh = bh.at[:, :action_dim].set(bm)
    bh = bh.at[:, action_dim:2 * action_dim].set(bs)

    return (w1o.astype(jnp.bfloat16), w1z.astype(jnp.bfloat16), b1p,
            w2p.astype(jnp.bfloat16), b2p,
            wh.astype(jnp.bfloat16), bh, action_dim)


# --------------------------------------------------------------------------
# ExpPEARLAgent.forward
# --------------------------------------------------------------------------
def exp_pearl_agent_forward(obs, task_z, params, eps):
    """obs: (t, b, obs_dim); task_z: (t*b, latent) or (t, latent); eps: (t*b, A)."""
    t, b, obs_dim = obs.shape
    n = t * b

    obs_flat = obs.reshape(n, obs_dim)                     # glue: view(t*b, -1)
    if task_z.shape[0] == t and t != n:
        # per-task z -> repeat across the batch axis (rlkit PEARL convention)
        task_z = jnp.repeat(task_z, b, axis=0)
    assert task_z.shape[0] == n, "task_z must have t*b (or t) rows"
    latent_dim = task_z.shape[1]
    task_z = jax.lax.stop_gradient(task_z)                 # glue: task_z.detach()

    (w1o, w1z, b1p, w2p, b2p, wh, bh, action_dim) = _pack_policy_params(
        params, obs_dim, latent_dim)

    # ---- row tiling: large TM to amortize per-step pipeline overhead, but
    # keep >= MIN_STEPS grid steps so the "parallel" axis shards across both
    # v7x TensorCores. TM is a multiple of 16 (bf16 sublane packing).
    MIN_STEPS = 4
    TM = min(2048, _round_up(n, 16))
    if pl.cdiv(n, TM) < MIN_STEPS and n >= MIN_STEPS * 16:
        TM = _round_up(pl.cdiv(n, MIN_STEPS), 16)
    n_pad = _round_up(n, TM)
    grid = (n_pad // TM,)

    SLAB = 5 * action_dim                  # [action|mean|log_std|std|pre_tanh]

    def pad_rows(x):
        return jnp.pad(x, ((0, n_pad - n), (0, 0))) if n_pad != n else x

    obs_in = pad_rows(obs_flat).astype(jnp.bfloat16)
    z_in = pad_rows(task_z).astype(jnp.bfloat16)
    eps_in = pad_rows(eps).astype(jnp.float32)

    def row_spec(width):                   # streamed, one block per grid step
        return pl.BlockSpec((TM, width), lambda i: (i, 0))

    def build(single_buffer_weights):
        if single_buffer_weights:
            def const_spec(shape):         # VMEM-resident, single-buffered
                return pl.BlockSpec(shape, lambda i: (0, 0),
                                    pipeline_mode=pl.Buffered(1))
        else:
            def const_spec(shape):         # default (double-buffered) resident
                return pl.BlockSpec(shape, lambda i: (0, 0))
        return pl.pallas_call(
            _tanh_gaussian_policy_kernel,
            out_shape=(jax.ShapeDtypeStruct((n_pad, SLAB), jnp.bfloat16),
                       jax.ShapeDtypeStruct((n_pad, 1), jnp.float32)),
            grid=grid,
            in_specs=[
                row_spec(obs_dim), row_spec(latent_dim), row_spec(action_dim),
                const_spec(w1o.shape), const_spec(w1z.shape), const_spec(b1p.shape),
                const_spec(w2p.shape), const_spec(b2p.shape),
                const_spec(wh.shape), const_spec(bh.shape),
            ],
            out_specs=(row_spec(SLAB), row_spec(1)),
            compiler_params=pltpu.CompilerParams(
                dimension_semantics=("parallel",),
                vmem_limit_bytes=32 * 1024 * 1024,
            ),
        )

    args = (obs_in, z_in, eps_in, w1o, w1z, b1p, w2p, b2p, wh, bh)
    try:
        slab, log_prob = build(True)(*args)
    except Exception:
        # Graceful fallback if this Pallas build rejects single-buffered
        # (pipeline_mode=pl.Buffered(1)) blocks for resident weights.
        slab, log_prob = build(False)(*args)

    # glue: unpack the lane-dense slab back into rlkit's tuple layout
    slab = slab[:n].astype(jnp.float32)
    log_prob = log_prob[:n]
    A = action_dim
    action = slab[:, 0 * A:1 * A]
    mean = slab[:, 1 * A:2 * A]
    log_std = slab[:, 2 * A:3 * A]
    std = slab[:, 3 * A:4 * A]
    pre_tanh = slab[:, 4 * A:5 * A]

    # rlkit TanhGaussianPolicy return order (unused slots are None):
    # (action, mean, log_std, log_prob, expected_log_prob, std,
    #  mean_action_log_prob, pre_tanh_value)
    return (action, mean, log_std, log_prob, None, std, None, pre_tanh)


def init_policy_params(key, in_dim, hidden, action_dim):
    ks = jax.random.split(key, 8)

    def lin(kw, kb, fan_in, fan_out):
        bound = 1.0 / jnp.sqrt(fan_in)
        w = jax.random.uniform(kw, (fan_in, fan_out), jnp.float32, -bound, bound)
        b = jax.random.uniform(kb, (1, fan_out), jnp.float32, -bound, bound)
        return w, b

    w1, b1 = lin(ks[0], ks[1], in_dim, hidden)
    w2, b2 = lin(ks[2], ks[3], hidden, hidden)
    wm, bm = lin(ks[4], ks[5], hidden, action_dim)
    ws, bs = lin(ks[6], ks[7], hidden, action_dim)
    return (w1, b1, w2, b2, wm, bm, ws, bs)


def _reference_forward(obs, task_z, params, eps):
    """Pure-JAX reference (same bf16 matmul operands / stable log-det as kernel)."""
    t, b, obs_dim = obs.shape
    n = t * b
    x = jnp.concatenate([obs.reshape(n, obs_dim), task_z], axis=1)
    w1, b1, w2, b2, wm, bm, ws, bs = params

    def mm(a, w):
        return jnp.dot(a.astype(jnp.bfloat16), w.astype(jnp.bfloat16),
                       preferred_element_type=jnp.float32)

    h1 = jnp.maximum(mm(x, w1) + b1, 0.0)
    h2 = jnp.maximum(mm(h1, w2) + b2, 0.0)
    mean = mm(h2, wm) + bm
    log_std = jnp.clip(mm(h2, ws) + bs, LOG_SIG_MIN, LOG_SIG_MAX)
    std = jnp.exp(log_std)
    pre = mean + std * eps
    act = jnp.tanh(pre)
    log1m_tanh_sq = 2.0 * (LOG2 - pre - jax.nn.softplus(-2.0 * pre))
    lp = -0.5 * eps * eps - log_std - HALF_LOG_2PI - log1m_tanh_sq
    return act, mean, log_std, jnp.sum(lp, axis=1, keepdims=True), std, pre


if __name__ == "__main__":
    # TODO(synk): infer_posterior / sample_z / update_context / compute_kl_div /
    # get_action are stateful context-encoder paths outside forward(); only the
    # policy hot path is implemented, with rsample noise `eps` supplied
    # externally (no in-kernel torch RNG).
    t, b = 2, 4
    obs_dim, latent_dim = 16, 8
    hidden, action_dim = 32, 4
    n = t * b

    key = jax.random.PRNGKey(0)
    k_obs, k_z, k_eps, k_params = jax.random.split(key, 4)

    obs = jax.random.normal(k_obs, (t, b, obs_dim), dtype=jnp.float32)
    task_z = jax.random.normal(k_z, (n, latent_dim), dtype=jnp.float32)
    eps = jax.random.normal(k_eps, (n, action_dim), dtype=jnp.float32)
    params = init_policy_params(k_params, obs_dim + latent_dim, hidden, action_dim)

    outs = exp_pearl_agent_forward(obs, task_z, params, eps)
    action, mean, log_std, log_prob, _, std, _, pre_tanh = outs
    jax.block_until_ready((action, mean, log_std, log_prob, std, pre_tanh))

    assert action.shape == (n, action_dim)
    assert log_prob.shape == (n, 1)
    assert bool(jnp.all(jnp.isfinite(action)))
    assert bool(jnp.all(jnp.isfinite(log_prob)))

    # correctness vs pure-JAX reference (tolerances allow bf16 matmuls + bf16
    # output slab rounding)
    r_act, r_mean, r_lstd, r_lp, r_std, r_pre = _reference_forward(
        obs, task_z, params, eps)
    assert float(jnp.max(jnp.abs(action - r_act))) < 5e-2
    assert float(jnp.max(jnp.abs(mean - r_mean))) < 5e-2
    assert float(jnp.max(jnp.abs(log_prob - r_lp))) < 2.5e-1
    assert bool(jnp.allclose(action, jnp.tanh(pre_tanh), atol=2e-2))

    print("KERNEL_OK")
</pallas_src>

<mosaic_0001>
module attributes {stable_mosaic.version = 11 : i64} {
  func.func @_tanh_gaussian_policy_kernel(%arg0: i32, %arg1: memref<16x16xbf16, #tpu.memory_space<vmem>>, %arg2: memref<16x8xbf16, #tpu.memory_space<vmem>>, %arg3: memref<16x4xf32, #tpu.memory_space<vmem>>, %arg4: memref<16x128xbf16, #tpu.memory_space<vmem>>, %arg5: memref<8x128xbf16, #tpu.memory_space<vmem>>, %arg6: memref<1x128xf32, #tpu.memory_space<vmem>>, %arg7: memref<128x128xbf16, #tpu.memory_space<vmem>>, %arg8: memref<1x128xf32, #tpu.memory_space<vmem>>, %arg9: memref<128x128xbf16, #tpu.memory_space<vmem>>, %arg10: memref<1x128xf32, #tpu.memory_space<vmem>>, %arg11: memref<16x20xbf16, #tpu.memory_space<vmem>>, %arg12: memref<16x1xf32, #tpu.memory_space<vmem>>) attributes {dimension_semantics = [#tpu.dimension_semantics<parallel>], iteration_bounds = array<i64: 1>, scalar_prefetch = 0 : i64, scratch_operands = 0 : i64, tpu.core_type = #tpu.core_type<tc>, window_params = [{transform_indices = @transform_0, window_bounds = array<i64: 16, 16>}, {transform_indices = @transform_1, window_bounds = array<i64: 16, 8>}, {transform_indices = @transform_2, window_bounds = array<i64: 16, 4>}, {pipeline_mode = #tpu.pipeline_mode<synchronous>, transform_indices = @transform_3, window_bounds = array<i64: 16, 128>}, {pipeline_mode = #tpu.pipeline_mode<synchronous>, transform_indices = @transform_4, window_bounds = array<i64: 8, 128>}, {pipeline_mode = #tpu.pipeline_mode<synchronous>, transform_indices = @transform_5, window_bounds = array<i64: 1, 128>}, {pipeline_mode = #tpu.pipeline_mode<synchronous>, transform_indices = @transform_6, window_bounds = array<i64: 128, 128>}, {pipeline_mode = #tpu.pipeline_mode<synchronous>, transform_indices = @transform_7, window_bounds = array<i64: 1, 128>}, {pipeline_mode = #tpu.pipeline_mode<synchronous>, transform_indices = @transform_8, window_bounds = array<i64: 128, 128>}, {pipeline_mode = #tpu.pipeline_mode<synchronous>, transform_indices = @transform_9, window_bounds = array<i64: 1, 128>}, {transform_indices = @transform_10, window_bounds = array<i64: 16, 20>}, {transform_indices = @transform_11, window_bounds = array<i64: 16, 1>}]} {
    %c0 = arith.constant 0 : index
    %c0_0 = arith.constant 0 : index
    %0 = vector.load %arg1[%c0, %c0_0] : memref<16x16xbf16, #tpu.memory_space<vmem>>, vector<16x16xbf16>
    %c0_1 = arith.constant 0 : index
    %c0_2 = arith.constant 0 : index
    %1 = vector.load %arg4[%c0_1, %c0_2] : memref<16x128xbf16, #tpu.memory_space<vmem>>, vector<16x128xbf16>
    %cst = arith.constant dense<0.000000e+00> : vector<16x128xf32>
    %2 = tpu.matmul %0, %1, %cst {dimension_numbers = #tpu.dot_dimension_numbers<[1], [0], [0], [1], [0, 0, 1, 1], [], []>} : vector<16x16xbf16>, vector<16x128xbf16>, vector<16x128xf32> -> vector<16x128xf32>
    %c0_3 = arith.constant 0 : index
    %c0_4 = arith.constant 0 : index
    %3 = vector.load %arg2[%c0_3, %c0_4] : memref<16x8xbf16, #tpu.memory_space<vmem>>, vector<16x8xbf16>
    %c0_5 = arith.constant 0 : index
    %c0_6 = arith.constant 0 : index
    %4 = vector.load %arg5[%c0_5, %c0_6] : memref<8x128xbf16, #tpu.memory_space<vmem>>, vector<8x128xbf16>
    %cst_7 = arith.constant dense<0.000000e+00> : vector<16x128xf32>
    %5 = tpu.matmul %3, %4, %cst_7 {dimension_numbers = #tpu.dot_dimension_numbers<[1], [0], [0], [1], [0, 0, 1, 1], [], []>} : vector<16x8xbf16>, vector<8x128xbf16>, vector<16x128xf32> -> vector<16x128xf32>
    %6 = arith.addf %2, %5 : vector<16x128xf32>
    %c0_8 = arith.constant 0 : index
    %c0_9 = arith.constant 0 : index
    %7 = vector.load %arg6[%c0_8, %c0_9] : memref<1x128xf32, #tpu.memory_space<vmem>>, vector<1x128xf32>
    %8 = vector.broadcast %7 : vector<1x128xf32> to vector<16x128xf32>
    %9 = arith.addf %6, %8 : vector<16x128xf32>
    %cst_10 = arith.constant 0.000000e+00 : f32
    %10 = vector.broadcast %cst_10 : f32 to vector<16x128xf32>
    %11 = arith.maximumf %9, %10 : vector<16x128xf32>
    %12 = arith.truncf %11 : vector<16x128xf32> to vector<16x128xbf16>
    %c0_11 = arith.constant 0 : index
    %c0_12 = arith.constant 0 : index
    %13 = vector.load %arg7[%c0_11, %c0_12] : memref<128x128xbf16, #tpu.memory_space<vmem>>, vector<128x128xbf16>
    %cst_13 = arith.constant dense<0.000000e+00> : vector<16x128xf32>
    %14 = tpu.matmul %12, %13, %cst_13 {dimension_numbers = #tpu.dot_dimension_numbers<[1], [0], [0], [1], [0, 0, 1, 1], [], []>} : vector<16x128xbf16>, vector<128x128xbf16>, vector<16x128xf32> -> vector<16x128xf32>
    %c0_14 = arith.constant 0 : index
    %c0_15 = arith.constant 0 : index
    %15 = vector.load %arg8[%c0_14, %c0_15] : memref<1x128xf32, #tpu.memory_space<vmem>>, vector<1x128xf32>
    %16 = vector.broadcast %15 : vector<1x128xf32> to vector<16x128xf32>
    %17 = arith.addf %14, %16 : vector<16x128xf32>
    %cst_16 = arith.constant 0.000000e+00 : f32
    %18 = vector.broadcast %cst_16 : f32 to vector<16x128xf32>
    %19 = arith.maximumf %17, %18 : vector<16x128xf32>
    %20 = arith.truncf %19 : vector<16x128xf32> to vector<16x128xbf16>
    %c0_17 = arith.constant 0 : index
    %c0_18 = arith.constant 0 : index
    %21 = vector.load %arg9[%c0_17, %c0_18] : memref<128x128xbf16, #tpu.memory_space<vmem>>, vector<128x128xbf16>
    %cst_19 = arith.constant dense<0.000000e+00> : vector<16x128xf32>
    %22 = tpu.matmul %20, %21, %cst_19 {dimension_numbers = #tpu.dot_dimension_numbers<[1], [0], [0], [1], [0, 0, 1, 1], [], []>} : vector<16x128xbf16>, vector<128x128xbf16>, vector<16x128xf32> -> vector<16x128xf32>
    %c0_20 = arith.constant 0 : index
    %c0_21 = arith.constant 0 : index
    %23 = vector.load %arg10[%c0_20, %c0_21] : memref<1x128xf32, #tpu.memory_space<vmem>>, vector<1x128xf32>
    %24 = vector.broadcast %23 : vector<1x128xf32> to vector<16x128xf32>
    %25 = arith.addf %22, %24 : vector<16x128xf32>
    %c0_22 = arith.constant 0 : index
    %c0_23 = arith.constant 0 : index
    %26 = vector.load %arg3[%c0_22, %c0_23] : memref<16x4xf32, #tpu.memory_space<vmem>>, vector<16x4xf32>
    %27 = vector.extract_strided_slice %25 {offsets = [0, 0], sizes = [16, 4], strides = [1, 1]} : vector<16x128xf32> to vector<16x4xf32>
    %28 = vector.extract_strided_slice %25 {offsets = [0, 4], sizes = [16, 4], strides = [1, 1]} : vector<16x128xf32> to vector<16x4xf32>
    %cst_24 = arith.constant -2.000000e+01 : f32
    %cst_25 = arith.constant 2.000000e+00 : f32
    %29 = vector.broadcast %cst_24 : f32 to vector<16x4xf32>
    %30 = arith.maximumf %29, %28 : vector<16x4xf32>
    %31 = vector.broadcast %cst_25 : f32 to vector<16x4xf32>
    %32 = arith.minimumf %31, %30 : vector<16x4xf32>
    %33 = math.exp %32 : vector<16x4xf32>
    %34 = arith.mulf %33, %26 : vector<16x4xf32>
    %35 = arith.addf %27, %34 : vector<16x4xf32>
    %36 = math.tanh %35 : vector<16x4xf32>
    %37 = arith.mulf %26, %26 : vector<16x4xf32>
    %cst_26 = arith.constant -5.000000e-01 : f32
    %38 = vector.broadcast %cst_26 : f32 to vector<16x4xf32>
    %39 = arith.mulf %38, %37 : vector<16x4xf32>
    %40 = arith.subf %39, %32 : vector<16x4xf32>
    %cst_27 = arith.constant 0.918938517 : f32
    %41 = vector.broadcast %cst_27 : f32 to vector<16x4xf32>
    %42 = arith.subf %40, %41 : vector<16x4xf32>
    %cst_28 = arith.constant -2.000000e+00 : f32
    %43 = vector.broadcast %cst_28 : f32 to vector<16x4xf32>
    %44 = arith.mulf %43, %35 : vector<16x4xf32>
    %cst_29 = arith.constant 0.000000e+00 : f32
    %45 = vector.broadcast %cst_29 : f32 to vector<16x4xf32>
    %46 = arith.maximumf %44, %45 : vector<16x4xf32>
    %47 = math.absf %44 : vector<16x4xf32>
    %cst_30 = arith.constant 0.000000e+00 : f32
    %48 = vector.broadcast %cst_30 : f32 to vector<16x4xf32>
    %49 = arith.subf %48, %47 : vector<16x4xf32>
    %50 = math.exp %49 : vector<16x4xf32>
    %cst_31 = arith.constant 1.000000e+00 : f32
    %51 = vector.broadcast %cst_31 : f32 to vector<16x4xf32>
    %52 = arith.addf %51, %50 : vector<16x4xf32>
    %53 = math.log %52 : vector<16x4xf32>
    %54 = arith.addf %46, %53 : vector<16x4xf32>
    %cst_32 = arith.constant 0.693147182 : f32
    %55 = vector.broadcast %cst_32 : f32 to vector<16x4xf32>
    %56 = arith.subf %55, %35 : vector<16x4xf32>
    %57 = arith.subf %56, %54 : vector<16x4xf32>
    %cst_33 = arith.constant 2.000000e+00 : f32
    %58 = vector.broadcast %cst_33 : f32 to vector<16x4xf32>
    %59 = arith.mulf %58, %57 : vector<16x4xf32>
    %60 = arith.subf %42, %59 : vector<16x4xf32>
    %cst_34 = arith.constant dense<0.000000e+00> : vector<16xf32>
    %61 = vector.multi_reduction <add>, %60, %cst_34 [1] : vector<16x4xf32> to vector<16xf32>
    %62 = vector.shape_cast %61 : vector<16xf32> to vector<16x1xf32>
    %c0_35 = arith.constant 0 : index
    %c0_36 = arith.constant 0 : index
    %63 = vector.load %arg12[%c0_35, %c0_36] : memref<16x1xf32, #tpu.memory_space<vmem>>, vector<16x1xf32>
    tpu.vector_store %arg12[%c0_35, %c0_36], %62 {strides = array<i32>} : memref<16x1xf32, #tpu.memory_space<vmem>>, vector<16x1xf32>,
    %64 = arith.truncf %36 : vector<16x4xf32> to vector<16x4xbf16>
    %c0_37 = arith.constant 0 : index
    %c0_38 = arith.constant 0 : index
    %65 = vector.load %arg11[%c0_37, %c0_38] : memref<16x20xbf16, #tpu.memory_space<vmem>>, vector<16x4xbf16>
    tpu.vector_store %arg11[%c0_37, %c0_38], %64 {strides = array<i32>} : memref<16x20xbf16, #tpu.memory_space<vmem>>, vector<16x4xbf16>,
    %66 = arith.truncf %27 : vector<16x4xf32> to vector<16x4xbf16>
    %c0_39 = arith.constant 0 : index
    %c4 = arith.constant 4 : index
    %67 = vector.load %arg11[%c0_39, %c4] : memref<16x20xbf16, #tpu.memory_space<vmem>>, vector<16x4xbf16>
    tpu.vector_store %arg11[%c0_39, %c4], %66 {strides = array<i32>} : memref<16x20xbf16, #tpu.memory_space<vmem>>, vector<16x4xbf16>,
    %68 = arith.truncf %32 : vector<16x4xf32> to vector<16x4xbf16>
    %c0_40 = arith.constant 0 : index
    %c8 = arith.constant 8 : index
    %69 = vector.load %arg11[%c0_40, %c8] : memref<16x20xbf16, #tpu.memory_space<vmem>>, vector<16x4xbf16>
    tpu.vector_store %arg11[%c0_40, %c8], %68 {strides = array<i32>} : memref<16x20xbf16, #tpu.memory_space<vmem>>, vector<16x4xbf16>,
    %70 = arith.truncf %33 : vector<16x4xf32> to vector<16x4xbf16>
    %c0_41 = arith.constant 0 : index
    %c12 = arith.constant 12 : index
    %71 = vector.load %arg11[%c0_41, %c12] : memref<16x20xbf16, #tpu.memory_space<vmem>>, vector<16x4xbf16>
    tpu.vector_store %arg11[%c0_41, %c12], %70 {strides = array<i32>} : memref<16x20xbf16, #tpu.memory_space<vmem>>, vector<16x4xbf16>,
    %72 = arith.truncf %35 : vector<16x4xf32> to vector<16x4xbf16>
    %c0_42 = arith.constant 0 : index
    %c16 = arith.constant 16 : index
    %73 = vector.load %arg11[%c0_42, %c16] : memref<16x20xbf16, #tpu.memory_space<vmem>>, vector<16x4xbf16>
    tpu.vector_store %arg11[%c0_42, %c16], %72 {strides = array<i32>} : memref<16x20xbf16, #tpu.memory_space<vmem>>, vector<16x4xbf16>,
    return
  }
  func.func @transform_0(%arg0: i32) -> (i32, i32) {
    %c0_i32 = arith.constant 0 : i32
    %c0_i32_0 = arith.constant 0 : i32
    return %arg0, %c0_i32 : i32, i32
  }
  func.func @transform_1(%arg0: i32) -> (i32, i32) {
    %c0_i32 = arith.constant 0 : i32
    %c0_i32_0 = arith.constant 0 : i32
    return %arg0, %c0_i32 : i32, i32
  }
  func.func @transform_2(%arg0: i32) -> (i32, i32) {
    %c0_i32 = arith.constant 0 : i32
    %c0_i32_0 = arith.constant 0 : i32
    return %arg0, %c0_i32 : i32, i32
  }
  func.func @transform_3(%arg0: i32) -> (i32, i32) {
    %c0_i32 = arith.constant 0 : i32
    %c0_i32_0 = arith.constant 0 : i32
    %c0_i32_1 = arith.constant 0 : i32
    return %c0_i32, %c0_i32_0 : i32, i32
  }
  func.func @transform_4(%arg0: i32) -> (i32, i32) {
    %c0_i32 = arith.constant 0 : i32
    %c0_i32_0 = arith.constant 0 : i32
    %c0_i32_1 = arith.constant 0 : i32
    return %c0_i32, %c0_i32_0 : i32, i32
  }
  func.func @transform_5(%arg0: i32) -> (i32, i32) {
    %c0_i32 = arith.constant 0 : i32
    %c0_i32_0 = arith.constant 0 : i32
    %c0_i32_1 = arith.constant 0 : i32
    return %c0_i32, %c0_i32_0 : i32, i32
  }
  func.func @transform_6(%arg0: i32) -> (i32, i32) {
    %c0_i32 = arith.constant 0 : i32
    %c0_i32_0 = arith.constant 0 : i32
    %c0_i32_1 = arith.constant 0 : i32
    return %c0_i32, %c0_i32_0 : i32, i32
  }
  func.func @transform_7(%arg0: i32) -> (i32, i32) {
    %c0_i32 = arith.constant 0 : i32
    %c0_i32_0 = arith.constant 0 : i32
    %c0_i32_1 = arith.constant 0 : i32
    return %c0_i32, %c0_i32_0 : i32, i32
  }
  func.func @transform_8(%arg0: i32) -> (i32, i32) {
    %c0_i32 = arith.constant 0 : i32
    %c0_i32_0 = arith.constant 0 : i32
    %c0_i32_1 = arith.constant 0 : i32
    return %c0_i32, %c0_i32_0 : i32, i32
  }
  func.func @transform_9(%arg0: i32) -> (i32, i32) {
    %c0_i32 = arith.constant 0 : i32
    %c0_i32_0 = arith.constant 0 : i32
    %c0_i32_1 = arith.constant 0 : i32
    return %c0_i32, %c0_i32_0 : i32, i32
  }
  func.func @transform_10(%arg0: i32) -> (i32, i32) {
    %c0_i32 = arith.constant 0 : i32
    %c0_i32_0 = arith.constant 0 : i32
    return %arg0, %c0_i32 : i32, i32
  }
  func.func @transform_11(%arg0: i32) -> (i32, i32) {
    %c0_i32 = arith.constant 0 : i32
    %c0_i32_0 = arith.constant 0 : i32
    return %arg0, %c0_i32 : i32, i32
  }
}

module attributes {stable_mosaic.version = 11 : i64} {
  func.func @_tanh_gaussian_policy_kernel(%arg0: i32, %arg1: memref<16x16xbf16, #tpu.memory_space<vmem>>, %arg2: memref<16x8xbf16, #tpu.memory_space<vmem>>, %arg3: memref<16x4xf32, #tpu.memory_space<vmem>>, %arg4: memref<16x128xbf16, #tpu.memory_space<vmem>>, %arg5: memref<8x128xbf16, #tpu.memory_space<vmem>>, %arg6: memref<1x128xf32, #tpu.memory_space<vmem>>, %arg7: memref<128x128xbf16, #tpu.memory_space<vmem>>, %arg8: memref<1x128xf32, #tpu.memory_space<vmem>>, %arg9: memref<128x128xbf16, #tpu.memory_space<vmem>>, %arg10: memref<1x128xf32, #tpu.memory_space<vmem>>, %arg11: memref<16x20xbf16, #tpu.memory_space<vmem>>, %arg12: memref<16x1xf32, #tpu.memory_space<vmem>>) attributes {dimension_semantics = [#tpu.dimension_semantics<parallel>], iteration_bounds = array<i64: 1>, scalar_prefetch = 0 : i64, scratch_operands = 0 : i64, tpu.core_type = #tpu.core_type<tc>, window_params = [{transform_indices = @transform_0, window_bounds = array<i64: 16, 16>}, {transform_indices = @transform_1, window_bounds = array<i64: 16, 8>}, {transform_indices = @transform_2, window_bounds = array<i64: 16, 4>}, {pipeline_mode = #tpu.pipeline_mode<synchronous>, transform_indices = @transform_3, window_bounds = array<i64: 16, 128>}, {pipeline_mode = #tpu.pipeline_mode<synchronous>, transform_indices = @transform_4, window_bounds = array<i64: 8, 128>}, {pipeline_mode = #tpu.pipeline_mode<synchronous>, transform_indices = @transform_5, window_bounds = array<i64: 1, 128>}, {pipeline_mode = #tpu.pipeline_mode<synchronous>, transform_indices = @transform_6, window_bounds = array<i64: 128, 128>}, {pipeline_mode = #tpu.pipeline_mode<synchronous>, transform_indices = @transform_7, window_bounds = array<i64: 1, 128>}, {pipeline_mode = #tpu.pipeline_mode<synchronous>, transform_indices = @transform_8, window_bounds = array<i64: 128, 128>}, {pipeline_mode = #tpu.pipeline_mode<synchronous>, transform_indices = @transform_9, window_bounds = array<i64: 1, 128>}, {transform_indices = @transform_10, window_bounds = array<i64: 16, 20>}, {transform_indices = @transform_11, window_bounds = array<i64: 16, 1>}]} {
    %c0 = arith.constant 0 : index
    %c0_0 = arith.constant 0 : index
    %0 = vector.load %arg1[%c0, %c0_0] : memref<16x16xbf16, #tpu.memory_space<vmem>>, vector<16x16xbf16>
    %c0_1 = arith.constant 0 : index
    %c0_2 = arith.constant 0 : index
    %1 = vector.load %arg4[%c0_1, %c0_2] : memref<16x128xbf16, #tpu.memory_space<vmem>>, vector<16x128xbf16>
    %cst = arith.constant dense<0.000000e+00> : vector<16x128xf32>
    %2 = tpu.matmul %0, %1, %cst {dimension_numbers = #tpu.dot_dimension_numbers<[1], [0], [0], [1], [0, 0, 1, 1], [], []>} : vector<16x16xbf16>, vector<16x128xbf16>, vector<16x128xf32> -> vector<16x128xf32>
    %c0_3 = arith.constant 0 : index
    %c0_4 = arith.constant 0 : index
    %3 = vector.load %arg2[%c0_3, %c0_4] : memref<16x8xbf16, #tpu.memory_space<vmem>>, vector<16x8xbf16>
    %c0_5 = arith.constant 0 : index
    %c0_6 = arith.constant 0 : index
    %4 = vector.load %arg5[%c0_5, %c0_6] : memref<8x128xbf16, #tpu.memory_space<vmem>>, vector<8x128xbf16>
    %cst_7 = arith.constant dense<0.000000e+00> : vector<16x128xf32>
    %5 = tpu.matmul %3, %4, %cst_7 {dimension_numbers = #tpu.dot_dimension_numbers<[1], [0], [0], [1], [0, 0, 1, 1], [], []>} : vector<16x8xbf16>, vector<8x128xbf16>, vector<16x128xf32> -> vector<16x128xf32>
    %6 = arith.addf %2, %5 : vector<16x128xf32>
    %c0_8 = arith.constant 0 : index
    %c0_9 = arith.constant 0 : index
    %7 = vector.load %arg6[%c0_8, %c0_9] : memref<1x128xf32, #tpu.memory_space<vmem>>, vector<1x128xf32>
    %8 = vector.broadcast %7 : vector<1x128xf32> to vector<16x128xf32>
    %9 = arith.addf %6, %8 : vector<16x128xf32>
    %cst_10 = arith.constant 0.000000e+00 : f32
    %10 = vector.broadcast %cst_10 : f32 to vector<16x128xf32>
    %11 = arith.maximumf %9, %10 : vector<16x128xf32>
    %12 = arith.truncf %11 : vector<16x128xf32> to vector<16x128xbf16>
    %c0_11 = arith.constant 0 : index
    %c0_12 = arith.constant 0 : index
    %13 = vector.load %arg7[%c0_11, %c0_12] : memref<128x128xbf16, #tpu.memory_space<vmem>>, vector<128x128xbf16>
    %cst_13 = arith.constant dense<0.000000e+00> : vector<16x128xf32>
    %14 = tpu.matmul %12, %13, %cst_13 {dimension_numbers = #tpu.dot_dimension_numbers<[1], [0], [0], [1], [0, 0, 1, 1], [], []>} : vector<16x128xbf16>, vector<128x128xbf16>, vector<16x128xf32> -> vector<16x128xf32>
    %c0_14 = arith.constant 0 : index
    %c0_15 = arith.constant 0 : index
    %15 = vector.load %arg8[%c0_14, %c0_15] : memref<1x128xf32, #tpu.memory_space<vmem>>, vector<1x128xf32>
    %16 = vector.broadcast %15 : vector<1x128xf32> to vector<16x128xf32>
    %17 = arith.addf %14, %16 : vector<16x128xf32>
    %cst_16 = arith.constant 0.000000e+00 : f32
    %18 = vector.broadcast %cst_16 : f32 to vector<16x128xf32>
    %19 = arith.maximumf %17, %18 : vector<16x128xf32>
    %20 = arith.truncf %19 : vector<16x128xf32> to vector<16x128xbf16>
    %c0_17 = arith.constant 0 : index
    %c0_18 = arith.constant 0 : index
    %21 = vector.load %arg9[%c0_17, %c0_18] : memref<128x128xbf16, #tpu.memory_space<vmem>>, vector<128x128xbf16>
    %cst_19 = arith.constant dense<0.000000e+00> : vector<16x128xf32>
    %22 = tpu.matmul %20, %21, %cst_19 {dimension_numbers = #tpu.dot_dimension_numbers<[1], [0], [0], [1], [0, 0, 1, 1], [], []>} : vector<16x128xbf16>, vector<128x128xbf16>, vector<16x128xf32> -> vector<16x128xf32>
    %c0_20 = arith.constant 0 : index
    %c0_21 = arith.constant 0 : index
    %23 = vector.load %arg10[%c0_20, %c0_21] : memref<1x128xf32, #tpu.memory_space<vmem>>, vector<1x128xf32>
    %24 = vector.broadcast %23 : vector<1x128xf32> to vector<16x128xf32>
    %25 = arith.addf %22, %24 : vector<16x128xf32>
    %c0_22 = arith.constant 0 : index
    %c0_23 = arith.constant 0 : index
    %26 = vector.load %arg3[%c0_22, %c0_23] : memref<16x4xf32, #tpu.memory_space<vmem>>, vector<16x4xf32>
    %27 = vector.extract_strided_slice %25 {offsets = [0, 0], sizes = [16, 4], strides = [1, 1]} : vector<16x128xf32> to vector<16x4xf32>
    %28 = vector.extract_strided_slice %25 {offsets = [0, 4], sizes = [16, 4], strides = [1, 1]} : vector<16x128xf32> to vector<16x4xf32>
    %cst_24 = arith.constant -2.000000e+01 : f32
    %cst_25 = arith.constant 2.000000e+00 : f32
    %29 = vector.broadcast %cst_24 : f32 to vector<16x4xf32>
    %30 = arith.maximumf %29, %28 : vector<16x4xf32>
    %31 = vector.broadcast %cst_25 : f32 to vector<16x4xf32>
    %32 = arith.minimumf %31, %30 : vector<16x4xf32>
    %33 = math.exp %32 : vector<16x4xf32>
    %34 = arith.mulf %33, %26 : vector<16x4xf32>
    %35 = arith.addf %27, %34 : vector<16x4xf32>
    %36 = math.tanh %35 : vector<16x4xf32>
    %37 = arith.mulf %26, %26 : vector<16x4xf32>
    %cst_26 = arith.constant -5.000000e-01 : f32
    %38 = vector.broadcast %cst_26 : f32 to vector<16x4xf32>
    %39 = arith.mulf %38, %37 : vector<16x4xf32>
    %40 = arith.subf %39, %32 : vector<16x4xf32>
    %cst_27 = arith.constant 0.918938517 : f32
    %41 = vector.broadcast %cst_27 : f32 to vector<16x4xf32>
    %42 = arith.subf %40, %41 : vector<16x4xf32>
    %cst_28 = arith.constant -2.000000e+00 : f32
    %43 = vector.broadcast %cst_28 : f32 to vector<16x4xf32>
    %44 = arith.mulf %43, %35 : vector<16x4xf32>
    %cst_29 = arith.constant 0.000000e+00 : f32
    %45 = vector.broadcast %cst_29 : f32 to vector<16x4xf32>
    %46 = arith.maximumf %44, %45 : vector<16x4xf32>
    %47 = math.absf %44 : vector<16x4xf32>
    %cst_30 = arith.constant 0.000000e+00 : f32
    %48 = vector.broadcast %cst_30 : f32 to vector<16x4xf32>
    %49 = arith.subf %48, %47 : vector<16x4xf32>
    %50 = math.exp %49 : vector<16x4xf32>
    %cst_31 = arith.constant 1.000000e+00 : f32
    %51 = vector.broadcast %cst_31 : f32 to vector<16x4xf32>
    %52 = arith.addf %51, %50 : vector<16x4xf32>
    %53 = math.log %52 : vector<16x4xf32>
    %54 = arith.addf %46, %53 : vector<16x4xf32>
    %cst_32 = arith.constant 0.693147182 : f32
    %55 = vector.broadcast %cst_32 : f32 to vector<16x4xf32>
    %56 = arith.subf %55, %35 : vector<16x4xf32>
    %57 = arith.subf %56, %54 : vector<16x4xf32>
    %cst_33 = arith.constant 2.000000e+00 : f32
    %58 = vector.broadcast %cst_33 : f32 to vector<16x4xf32>
    %59 = arith.mulf %58, %57 : vector<16x4xf32>
    %60 = arith.subf %42, %59 : vector<16x4xf32>
    %cst_34 = arith.constant dense<0.000000e+00> : vector<16xf32>
    %61 = vector.multi_reduction <add>, %60, %cst_34 [1] : vector<16x4xf32> to vector<16xf32>
    %62 = vector.shape_cast %61 : vector<16xf32> to vector<16x1xf32>
    %c0_35 = arith.constant 0 : index
    %c0_36 = arith.constant 0 : index
    %63 = vector.load %arg12[%c0_35, %c0_36] : memref<16x1xf32, #tpu.memory_space<vmem>>, vector<16x1xf32>
    tpu.vector_store %arg12[%c0_35, %c0_36], %62 {strides = array<i32>} : memref<16x1xf32, #tpu.memory_space<vmem>>, vector<16x1xf32>,
    %64 = arith.truncf %36 : vector<16x4xf32> to vector<16x4xbf16>
    %c0_37 = arith.constant 0 : index
    %c0_38 = arith.constant 0 : index
    %65 = vector.load %arg11[%c0_37, %c0_38] : memref<16x20xbf16, #tpu.memory_space<vmem>>, vector<16x4xbf16>
    tpu.vector_store %arg11[%c0_37, %c0_38], %64 {strides = array<i32>} : memref<16x20xbf16, #tpu.memory_space<vmem>>, vector<16x4xbf16>,
    %66 = arith.truncf %27 : vector<16x4xf32> to vector<16x4xbf16>
    %c0_39 = arith.constant 0 : index
    %c4 = arith.constant 4 : index
    %67 = vector.load %arg11[%c0_39, %c4] : memref<16x20xbf16, #tpu.memory_space<vmem>>, vector<16x4xbf16>
    tpu.vector_store %arg11[%c0_39, %c4], %66 {strides = array<i32>} : memref<16x20xbf16, #tpu.memory_space<vmem>>, vector<16x4xbf16>,
    %68 = arith.truncf %32 : vector<16x4xf32> to vector<16x4xbf16>
    %c0_40 = arith.constant 0 : index
    %c8 = arith.constant 8 : index
    %69 = vector.load %arg11[%c0_40, %c8] : memref<16x20xbf16, #tpu.memory_space<vmem>>, vector<16x4xbf16>
    tpu.vector_store %arg11[%c0_40, %c8], %68 {strides = array<i32>} : memref<16x20xbf16, #tpu.memory_space<vmem>>, vector<16x4xbf16>,
    %70 = arith.truncf %33 : vector<16x4xf32> to vector<16x4xbf16>
    %c0_41 = arith.constant 0 : index
    %c12 = arith.constant 12 : index
    %71 = vector.load %arg11[%c0_41, %c12] : memref<16x20xbf16, #tpu.memory_space<vmem>>, vector<16x4xbf16>
    tpu.vector_store %arg11[%c0_41, %c12], %70 {strides = array<i32>} : memref<16x20xbf16, #tpu.memory_space<vmem>>, vector<16x4xbf16>,
    %72 = arith.truncf %35 : vector<16x4xf32> to vector<16x4xbf16>
    %c0_42 = arith.constant 0 : index
    %c16 = arith.constant 16 : index
    %73 = vector.load %arg11[%c0_42, %c16] : memref<16x20xbf16, #tpu.memory_space<vmem>>, vector<16x4xbf16>
    tpu.vector_store %arg11[%c0_42, %c16], %72 {strides = array<i32>} : memref<16x20xbf16, #tpu.memory_space<vmem>>, vector<16x4xbf16>,
    return
  }
  func.func @transform_0(%arg0: i32) -> (i32, i32) {
    %c0_i32 = arith.constant 0 : i32
    %c0_i32_0 = arith.constant 0 : i32
    return %arg0, %c0_i32 : i32, i32
  }
  func.func @transform_1(%arg0: i32) -> (i32, i32) {
    %c0_i32 = arith.constant 0 : i32
    %c0_i32_0 = arith.constant 0 : i32
    return %arg0, %c0_i32 : i32, i32
  }
  func.func @transform_2(%arg0: i32) -> (i32, i32) {
    %c0_i32 = arith.constant 0 : i32
    %c0_i32_0 = arith.constant 0 : i32
    return %arg0, %c0_i32 : i32, i32
  }
  func.func @transform_3(%arg0: i32) -> (i32, i32) {
    %c0_i32 = arith.constant 0 : i32
    %c0_i32_0 = arith.constant 0 : i32
    %c0_i32_1 = arith.constant 0 : i32
    return %c0_i32, %c0_i32_0 : i32, i32
  }
  func.func @transform_4(%arg0: i32) -> (i32, i32) {
    %c0_i32 = arith.constant 0 : i32
    %c0_i32_0 = arith.constant 0 : i32
    %c0_i32_1 = arith.constant 0 : i32
    return %c0_i32, %c0_i32_0 : i32, i32
  }
  func.func @transform_5(%arg0: i32) -> (i32, i32) {
    %c0_i32 = arith.constant 0 : i32
    %c0_i32_0 = arith.constant 0 : i32
    %c0_i32_1 = arith.constant 0 : i32
    return %c0_i32, %c0_i32_0 : i32, i32
  }
  func.func @transform_6(%arg0: i32) -> (i32, i32) {
    %c0_i32 = arith.constant 0 : i32
    %c0_i32_0 = arith.constant 0 : i32
    %c0_i32_1 = arith.constant 0 : i32
    return %c0_i32, %c0_i32_0 : i32, i32
  }
  func.func @transform_7(%arg0: i32) -> (i32, i32) {
    %c0_i32 = arith.constant 0 : i32
    %c0_i32_0 = arith.constant 0 : i32
    %c0_i32_1 = arith.constant 0 : i32
    return %c0_i32, %c0_i32_0 : i32, i32
  }
  func.func @transform_8(%arg0: i32) -> (i32, i32) {
    %c0_i32 = arith.constant 0 : i32
    %c0_i32_0 = arith.constant 0 : i32
    %c0_i32_1 = arith.constant 0 : i32
    return %c0_i32, %c0_i32_0 : i32, i32
  }
  func.func @transform_9(%arg0: i32) -> (i32, i32) {
    %c0_i32 = arith.constant 0 : i32
    %c0_i32_0 = arith.constant 0 : i32
    %c0_i32_1 = arith.constant 0 : i32
    return %c0_i32, %c0_i32_0 : i32, i32
  }
  func.func @transform_10(%arg0: i32) -> (i32, i32) {
    %c0_i32 = arith.constant 0 : i32
    %c0_i32_0 = arith.constant 0 : i32
    return %arg0, %c0_i32 : i32, i32
  }
  func.func @transform_11(%arg0: i32) -> (i32, i32) {
    %c0_i32 = arith.constant 0 : i32
    %c0_i32_0 = arith.constant 0 : i32
    return %arg0, %c0_i32 : i32, i32
  }
}

</mosaic_0001>

<bundles_post_ra>
// kernel: tpu_custom_call.1
= control target key start
LH: loop header
LB: loop body
LE: loop exit
PB: predicated region body
PF: predicated region fallthrough
CT: control target
= control target key end

     0   :  { %17 = vsyncpa [#allocation3], 0  ;;  %s1010_s0 = inlined_call_operand.vmem [shape: bf16[16,16], index: 0, kind: input, shape index: {}]   ;;  %s1011_s1 = inlined_call_operand.vmem [shape: bf16[16,8], index: 1, kind: input, shape index: {}]   ;;  %s1012_s2 = inlined_call_operand.vmem [shape: f32[16,4], index: 2, kind: input, shape index: {}]   ;;  %s1013_s3 = inlined_call_operand.vmem [shape: bf16[16,128], index: 3, kind: input, shape index: {}]   ;;  %s1014_s4 = inlined_call_operand.vmem [shape: bf16[8,128], index: 4, kind: input, shape index: {}]   ;;  %s1015_s5 = inlined_call_operand.vmem [shape: f32[1,128], index: 5, kind: input, shape index: {}]   ;;  %s1016_s6 = inlined_call_operand.hbm [shape: bf16[128,128], index: 6, kind: input, shape index: {}]   ;;  %s1017_s7 = inlined_call_operand.vmem [shape: f32[1,128], index: 7, kind: input, shape index: {}]   ;;  %s1018_s8 = inlined_call_operand.hbm [shape: bf16[128,128], index: 8, kind: input, shape index: {}]   ;;  %s1019_s9 = inlined_call_operand.vmem [shape: f32[1,128], index: 9, kind: input, shape index: {}]   ;;  %s1020_s10 = inlined_call_operand.hbm [shape: bf16[16,20], index: 10, kind: output, shape index: {0}]   ;;  %s1021_s11 = inlined_call_operand.vmem [shape: f32[16,1], index: 11, kind: output, shape index: {1}]  }
   0x1   :  { %18 = vsyncpa [#allocation6], 0 }
   0x2   :  { %19 = vsyncpa [#allocation4], 0  ;;  %s833_s17 = smov [#allocation2]  }
   0x3   :  { %s37_s18 = sshll.u32 %s833_s17, 4  ;;  %s38_s18 = int_to_ptr.vmem [resolvable:$true] %s37_s18 }
   0x4   :  { %s775_s19 = scalar_lea.vmem %s38_s18, 1024  ;;  %p780_p1 = scmp.lt.s32.totalorder %s38_s18, %s38_s18 }
   0x5   :  { %p776_p0 = scmp.ne.s32.totalorder %s38_s18, %s775_s19  ;;  %p781_p2 = scmp.lt.s32.totalorder %s775_s19, %s775_s19 }
   0x7   :  { %p782_p3 = por %p781_p2, %p780_p1 }
   0x9   :  { %p783_p4 = pnand %p782_p3, %p776_p0 }
   0xb   :  { %786 = shalt.err (!%p783_p4)
}
   0xc   :  { %s834_s20 = smov 64   ;;  %s835_s21 = smov 4  }
   0xd   :  { %43 = dma.hbm_to_vmem [thread:$0]  %s1016_s6, 1024, %s38_s18, [#allocation3], %s834_s20, %s834_s20, %s835_s21  }
   0xe   :  { %s836_s24 = smov [#allocation5]  }
   0xf   :  { %s51_s25 = sshll.u32 %s836_s24, 4  ;;  %s52_s25 = int_to_ptr.vmem [resolvable:$true] %s51_s25 }
  0x10   :  { %s795_s26 = scalar_lea.vmem %s52_s25, 1024  ;;  %p800_p6 = scmp.lt.s32.totalorder %s52_s25, %s52_s25 }
  0x11   :  { %p796_p5 = scmp.ne.s32.totalorder %s52_s25, %s795_s26  ;;  %p801_p7 = scmp.lt.s32.totalorder %s795_s26, %s795_s26 }
  0x13   :  { %p802_p8 = por %p801_p7, %p800_p6 }
  0x15   :  { %p803_p9 = pnand %p802_p8, %p796_p5 }
  0x17   :  { %806 = shalt.err (!%p803_p9)
}
  0x18   :  { %57 = dma.hbm_to_vmem [thread:$0]  %s1018_s8, 1024, %s52_s25, [#allocation6], %s834_s20, %s834_s20, %s835_s21  }
  0x19   :  { %827 = dma.done.wait [#allocation3], 1024  }
  0x1a   :  { %828 = vsyncadd [#allocation3], 4294966272 }
  0x1b   :  { %829 = dma.done.wait [#allocation6], 1024  }
  0x1c   :  { %830 = vsyncadd [#allocation6], 4294966272  ;;  %v837_v0 = vmov 0.0   ;;  %vm838_vm0 = vmmov 0   ;;  %vm83_vm1 = vcmask 1043456   ;;  %v732_v3 = vld [vmem:[%s1013_s3] sm:$0xff]  }
  0x1d   :  { %670 = vmatprep.subr.bf16.mxu0 %v837_v0  ;;  %676 = vmatprep.subr.bf16.mxu1 %v837_v0  ;;  %v73_v1 = vld [vmem:[%s1014_s4] sm:$0xf]  ;;  %vm79_vm2 = vcmask 64512   ;;  %vm139_vm3 = vcmask 130048   ;;  %v735_v6 = vld [vmem:[#allocation2 + $0x38] sm:$0xff]   ;;  %v736_v7 = vld [vmem:[#allocation2 + $0x30] sm:$0xff]  }
  0x1e   :  { %672 = vmatprep.mubr.msk.bf16.mxu0 %vm838_vm0, %v837_v0  ;;  %678 = vmatprep.mubr.msk.bf16.mxu1 %vm838_vm0, %v837_v0  ;;  %v85_v2 = vsel %vm83_vm1, %v73_v1, 0  ;;  %v733_v4 = vld [vmem:[%s1011_s1] sm:$0xff]   ;;  %v737_v8 = vld [vmem:[#allocation2 + $0x28] sm:$0xff]   ;;  %v739_v10 = vld [vmem:[#allocation2 + $0x18] sm:$0xff]   ;;  %vm517_vm4 = vcmask 27648   ;;  %vm532_vm5 = vcmask 60448  }
  0x1f   :  { %671 = vmatpush3.bf16.msra.mxu0 %v85_v2  ;;  %677 = vmatpush3.bf16.msra.mxu1 %v732_v3  ;;  %v734_v5 = vld [vmem:[%s1010_s0] sm:$0xff]   ;;  %v740_v11 = vld [vmem:[#allocation2 + $0x10] sm:$0xff]   ;;  %v741_v12 = vld [vmem:[#allocation2 + $0x8] sm:$0xff]   ;;  %vm547_vm6 = vcmask 93248   ;;  %vm562_vm7 = vcmask 126048   ;;  %vm499_vm8 = vcmask 31744  }
  0x20   :  { %682 = vmatprep.subr.bf16.mxu0 %v837_v0  ;;  %702 = vmatprep.subr.bf16.mxu1 %v837_v0  ;;  %v738_v9 = vld [vmem:[#allocation2 + $0x20] sm:$0xff]   ;;  %v743_v14 = vld [vmem:[#allocation5 + $0x38] sm:$0xff]   ;;  %v744_v15 = vld [vmem:[#allocation5 + $0x30] sm:$0xff]   ;;  %s841_s22 = smov 16   ;;  %vm506_vm9 = vcmask 7168   ;;  %vm577_vm10 = vcmask 158848  }
  0x21   :  { %v742_v13 = vld [vmem:[#allocation2] sm:$0xff]   ;;  %v745_v16 = vld [vmem:[#allocation5 + $0x28] sm:$0xff]   ;;  %v747_v18 = vld [vmem:[#allocation5 + $0x18] sm:$0xff]   ;;  %s842_s25 = smov [#allocation7]  }
  0x22   :  { %673 = vmatmul.mubr.msk.bf16.vlgmr.msra.gmra.mxu0 %vm79_vm2, %v733_v4  ;;  %679 = vmatmul.mubr.msk.bf16.vlgmr.msra.gmra.mxu1 %vm139_vm3, %v734_v5  ;;  %v746_v17 = vld [vmem:[#allocation5 + $0x20] sm:$0xff]   ;;  %v748_v35 = vld [vmem:[#allocation5 + $0x10] sm:$0xff]   ;;  %v749_v36 = vld [vmem:[#allocation5 + $0x8] sm:$0xff]   ;;  %s585_s26 = sshll.u32 %s842_s25, 4  ;;  %s586_s26 = int_to_ptr.vmem [resolvable:$true] %s585_s26 }
  0x23   :  { %683 = vmatpush3.bf16.msra.mxu0 %v735_v6  ;;  %698 = vmatprep.mubr.msk.bf16.mxu0 %vm838_vm0, %v837_v0  ;;  %v607_v23 = vld [vmem:[%s1015_s5] ss:$0 sm:$0xff]  ;;  %v966_v39 = vld [vmem:[%s1012_s2 + $0x8] sm:$0xff]  ;;  %s807_s6 = scalar_lea.vmem %s586_s26, 128  ;;  %p812_p11 = scmp.lt.s32.totalorder %s586_s26, %s586_s26 }
  0x24   :  { %684 = vmatprep.subr.bf16.mxu0 %v837_v0  ;;  %718 = vmatprep.mubr.msk.bf16.mxu1 %vm838_vm0, %v837_v0  ;;  %v750_v37 = vld [vmem:[#allocation5] sm:$0xff]   ;;  %p808_p10 = scmp.ne.s32.totalorder %s586_s26, %s807_s6  ;;  %p813_p12 = scmp.lt.s32.totalorder %s807_s6, %s807_s6 }
  0x25   :  { %703 = vmatpush3.bf16.msra.mxu1 %v743_v14  ;;  %v959_v38 = vld [vmem:[%s1012_s2] sm:$0xff] }
  0x26   :  { %704 = vmatprep.subr.bf16.mxu1 %v837_v0  ;;  %435 = vrot.lane.b32.xlu0 %v959_v38, %s835_s21  ;;  %v608_v40 = vld [vmem:[%s1017_s7] ss:$0 sm:$0xff]  ;;  %s839_s7 = smov 124   ;;  %p814_p13 = por %p813_p12, %p812_p11 }
  0x27   :  { %685 = vmatpush3.bf16.msra.mxu0 %v736_v7  ;;  %v617_v50 = vld [vmem:[%s1019_s9] ss:$0 sm:$0xff]  ;;  %s840_s9 = smov 8  }
  0x28   :  { %686 = vmatprep.subr.bf16.mxu0 %v837_v0  ;;  %p815_p0 = pnand %p814_p13, %p808_p10 }
  0x29   :  { %705 = vmatpush3.bf16.msra.mxu1 %v744_v15 }
  0x2a   :  { %706 = vmatprep.subr.bf16.mxu1 %v837_v0  ;;  %437 = vrot.lane.b32.xlu0 %v966_v39, %s835_s21 }
  0x2b   :  { %687 = vmatpush3.bf16.msra.mxu0 %v737_v8 }
  0x2c   :  { %688 = vmatprep.subr.bf16.mxu0 %v837_v0 }
  0x2d   :  { %707 = vmatpush3.bf16.msra.mxu1 %v745_v16 }
  0x2e   :  { %708 = vmatprep.subr.bf16.mxu1 %v837_v0 }
  0x2f   :  { %689 = vmatpush3.bf16.msra.mxu0 %v738_v9 }
  0x30   :  { %690 = vmatprep.subr.bf16.mxu0 %v837_v0 }
  0x31   :  { %709 = vmatpush3.bf16.msra.mxu1 %v746_v17 }
  0x32   :  { %710 = vmatprep.subr.bf16.mxu1 %v837_v0 }
  0x33   :  { %691 = vmatpush3.bf16.msra.mxu0 %v739_v10 }
  0x34   :  { %692 = vmatprep.subr.bf16.mxu0 %v837_v0 }
  0x35   :  { %711 = vmatpush3.bf16.msra.mxu1 %v747_v18 }
  0x36   :  { %712 = vmatprep.subr.bf16.mxu1 %v837_v0 }
  0x37   :  { %693 = vmatpush3.bf16.msra.mxu0 %v740_v11 }
  0x38   :  { %694 = vmatprep.subr.bf16.mxu0 %v837_v0 }
  0x39   :  { %713 = vmatpush3.bf16.msra.mxu1 %v748_v35 }
  0x3a   :  { %714 = vmatprep.subr.bf16.mxu1 %v837_v0 }
  0x3b   :  { %695 = vmatpush3.bf16.msra.mxu0 %v741_v12 }
  0x3c   :  { %696 = vmatprep.subr.bf16.mxu0 %v837_v0 }
  0x3d   :  { %715 = vmatpush3.bf16.msra.mxu1 %v749_v36 }
  0x3e   :  { %716 = vmatprep.subr.bf16.mxu1 %v837_v0 }
  0x3f   :  { %697 = vmatpush3.bf16.msra.mxu0 %v742_v13 }
  0x41   :  { %717 = vmatpush3.bf16.msra.mxu1 %v750_v37 }
  0x98   :  { %v436_v1 = vpop.permute.xlu0 %435 }
  0x9c   :  { %v438_v5 = vpop.permute.xlu0 %437 }
  0xe2   :  { %v121_v19 = vpop.f32.mrf.mxu0  ;;  %v177_v20 = vpop.f32.mrf.mxu1 }
  0xe3   :  { %v178_v21 = vadd.f32 %v177_v20, %v121_v19 }
  0xe4   :  { %v674_v22 = vpop.f32.mrf.mxu0  ;;  %v680_v24 = vpop.f32.mrf.mxu1 }
  0xe5   :  { %v191_v27 = vadd.f32 %v607_v23, %v178_v21 }
  0xe6   :  { %v124_v25 = vpop.f32.mrf.mxu0  ;;  %v180_v26 = vpop.f32.mrf.mxu1 }
  0xe7   :  { %v181_v28 = vadd.f32 %v180_v26, %v124_v25  ;;  %v193_v32 = vmax.f32 %v191_v27, 0.0 }
  0xe8   :  { %v675_v29 = vpop.f32.mrf.mxu0  ;;  %v681_v30 = vpop.f32.mrf.mxu1 }
  0xe9   :  { %v192_v31 = vadd.f32 %v607_v23, %v181_v28 }
  0xeb   :  { %v194_v33 = vmax.f32 %v192_v31, 0.0 }
  0xed   :  { %v195_v34 = vpack.c.bf16 %v194_v33, %v193_v32 }
  0xef   :  { %699 = vmatmul.mubr.bf16.vlgmr.msra.gmra.mxu0 %v195_v34 }
 0x1af   :  { %v301_v41 = vpop.f32.mrf.mxu0 }
 0x1b0   :  { %v302_v43 = vadd.f32 %v608_v40, %v301_v41  ;;  %v455_v41 = vmul.f32 %v959_v38, %v959_v38 }
 0x1b1   :  { %v700_v42 = vpop.f32.mrf.mxu0 }
 0x1b2   :  { %v308_v47 = vmax.f32 %v302_v43, 0.0  ;;  %v457_v42 = vmul.f32 -0.5, %v455_v41  ;;  %v456_v43 = vmul.f32 %v966_v39, %v966_v39 }
 0x1b3   :  { %v304_v44 = vpop.f32.mrf.mxu0 }
 0x1b4   :  { %v305_v45 = vadd.f32 %v608_v40, %v304_v44 }
 0x1b5   :  { %v701_v46 = vpop.f32.mrf.mxu0 }
 0x1b6   :  { %v309_v48 = vmax.f32 %v305_v45, 0.0 }
 0x1b8   :  { %v310_v49 = vpack.c.bf16 %v309_v48, %v308_v47  ;;  %v458_v48 = vmul.f32 -0.5, %v456_v43 }
 0x1ba   :  { %719 = vmatmul.mubr.bf16.vlgmr.msra.gmra.mxu1 %v310_v49 }
 0x27a   :  { %v416_v51 = vpop.f32.mrf.mxu1 }
 0x27b   :  { %v417_v52 = vadd.f32 %v617_v50, %v416_v51 }
 0x27c   :  { %v720_v53 = vpop.f32.mrf.mxu1 }
 0x27d   :  { %v425_v54 = vmax.f32 %v417_v52, -20.0  ;;  %v640_v62 = vpack.c.bf16 %v417_v52, %v417_v52 }
 0x27e   :  { %v419_v55 = vpop.f32.mrf.mxu1 }
 0x27f   :  { %v420_v56 = vadd.f32 %v617_v50, %v419_v55  ;;  %v427_v57 = vmin.f32 %v425_v54, 2.0 }
 0x280   :  { %v721_v58 = vpop.f32.mrf.mxu1 }
 0x281   :  { %v426_v59 = vmax.f32 %v420_v56, -20.0  ;;  %461 = vrot.lane.b32.xlu0 %v427_v57, %s839_s7  ;;  %v429_v60 = vmul.f32 1.442695, %v427_v57  ;;  %v642_v0 = vpack.c.bf16 %v427_v57, %v427_v57  ;;  %v641_v8 = vpack.c.bf16 %v420_v56, %v420_v56 }
 0x283   :  { %v428_v61 = vmin.f32 %v426_v59, 2.0  ;;  %751 = vpow2.f32 %v429_v60 }
 0x285   :  { %v431_v63 = vmul.f32 1.442695, %v428_v61  ;;  %526 = vrot.lane.b32.xlu0 %v640_v62, %s835_s21  ;;  %v643_v9 = vpack.c.bf16 %v428_v61, %v428_v61 }
 0x287   :  { %753 = vpow2.f32 %v431_v63 }
 0x289   :  { %541 = vrot.lane.b32.xlu0 %v642_v0, %s835_s21 }
 0x290   :  { %v752_v2 = vpop.eup %751 }
 0x291   :  { %v441_v3 = vmul.f32 %v752_v2, %v436_v1  ;;  %v644_v4 = vpack.c.bf16 %v752_v2, %v752_v2 }
 0x293   :  { %556 = vrot.lane.b32.xlu0 %v644_v4, %s840_s9  ;;  %445 = vrot.lane.b32.xlu1 %v441_v3, %s839_s7 }
 0x294   :  { %v754_v6 = vpop.eup %753 }
 0x295   :  { %v442_v7 = vmul.f32 %v754_v6, %v438_v5  ;;  %v645_v10 = vpack.c.bf16 %v754_v6, %v754_v6 }
 0x297   :  { %447 = vrot.lane.b32.xlu1 %v442_v7, %s839_s7 }
 0x29b   :  { %463 = vrot.lane.b32.xlu1 %v428_v61, %s839_s7 }
 0x29f   :  { %528 = vrot.lane.b32.xlu1 %v641_v8, %s835_s21 }
 0x2a3   :  { %543 = vrot.lane.b32.xlu1 %v643_v9, %s835_s21 }
 0x2a7   :  { %558 = vrot.lane.b32.xlu1 %v645_v10, %s840_s9 }
 0x2f3   :  { %v462_v15 = vpop.permute.xlu0 %461 }
 0x2f4   :  { %v467_v47 = vsub.f32 %v457_v42, %v462_v15 }
 0x2f6   :  { %v626_v55 = vadd.f32 -0.9189385, %v467_v47 }
 0x2f7   :  { %v527_v23 = vpop.permute.xlu0 %526 }
 0x2fb   :  { %v542_v28 = vpop.permute.xlu0 %541 }
 0x305   :  { %v446_v11 = vpop.permute.xlu1 %445  ;;  %v557_v32 = vpop.permute.xlu0 %556 }
 0x306   :  { %v980_v12 = vadd.f32 %v446_v11, %v417_v52 }
 0x308   :  { %755 = vtanh.f32 %v980_v12  ;;  %v471_v13 = vmul.f32 -2.0, %v980_v12  ;;  %v491_v50 = vsub.f32 0.6931472, %v980_v12  ;;  %v646_v2 = vpack.c.bf16 %v980_v12, %v980_v12 }
 0x309   :  { %v448_v14 = vpop.permute.xlu1 %447 }
 0x30a   :  { %v475_v16 = vand.u32 2147483647, %v471_v13  ;;  %v984_v17 = vadd.f32 %v448_v14, %v420_v56  ;;  %v473_v45 = vmax.f32 %v471_v13, 0.0 }
 0x30c   :  { %v477_v18 = vsub.f32 0.0, %v475_v16  ;;  %757 = vtanh.f32 %v984_v17  ;;  %v472_v19 = vmul.f32 -2.0, %v984_v17  ;;  %v492_v58 = vsub.f32 0.6931472, %v984_v17 }
 0x30d   :  { %v464_v20 = vpop.permute.xlu1 %463  ;;  %v647_v1 = vpack.c.bf16 %v984_v17, %v984_v17 }
 0x30e   :  { %v479_v21 = vmul.f32 1.442695, %v477_v18  ;;  %v476_v22 = vand.u32 2147483647, %v472_v19  ;;  %v474_v53 = vmax.f32 %v472_v19, 0.0  ;;  %v468_v56 = vsub.f32 %v458_v48, %v464_v20 }
 0x310   :  { %759 = vpow2.f32 %v479_v21  ;;  %v478_v24 = vsub.f32 0.0, %v476_v22  ;;  %v627_v60 = vadd.f32 -0.9189385, %v468_v56 }
 0x311   :  { %v529_v26 = vpop.permute.xlu1 %528 }
 0x312   :  { %v481_v25 = vmul.f32 1.442695, %v478_v24 }
 0x314   :  { %761 = vpow2.f32 %v481_v25 }
 0x315   :  { %v756_v27 = vpop.eup %755  ;;  %v544_v30 = vpop.permute.xlu1 %543 }
 0x316   :  { %v638_v29 = vpack.c.bf16 %v756_v27, %v756_v27 }
 0x318   :  { %518 = vst.msk [vmem:[#allocation7] sm:$0xf] %vm517_vm4, %v638_v29 }
 0x319   :  { %v758_v31 = vpop.eup %757  ;;  %533 = vst.msk [vmem:[#allocation7] sm:$0xf] %vm532_vm5, %v527_v23  ;;  %v559_v35 = vpop.permute.xlu1 %558 }
 0x31a   :  { %v639_v33 = vpack.c.bf16 %v758_v31, %v758_v31  ;;  %548 = vst.msk [vmem:[#allocation7] sm:$0xf] %vm547_vm6, %v542_v28 }
 0x31b   :  { %563 = vst.msk [vmem:[#allocation7] sm:$0xf] %vm562_vm7, %v557_v32 }
 0x31c   :  { %519 = vst.msk [vmem:[#allocation7 + $0x4] sm:$0xf] %vm517_vm4, %v639_v33 }
 0x31d   :  { %v760_v34 = vpop.eup %759  ;;  %534 = vst.msk [vmem:[#allocation7 + $0x4] sm:$0xf] %vm532_vm5, %v529_v26 }
 0x31e   :  { %549 = vst.msk [vmem:[#allocation7 + $0x4] sm:$0xf] %vm547_vm6, %v544_v30  ;;  %v483_v36 = vadd.f32 1.0, %v760_v34 }
 0x31f   :  { %564 = vst.msk [vmem:[#allocation7 + $0x4] sm:$0xf] %vm562_vm7, %v559_v35 }
 0x320   :  { %763 = vlog2.f32 %v483_v36 }
 0x321   :  { %v762_v37 = vpop.eup %761 }
 0x322   :  { %v484_v40 = vadd.f32 1.0, %v762_v37 }
 0x324   :  { %765 = vlog2.f32 %v484_v40 }
 0x32d   :  { %v764_v44 = vpop.eup %763 }
 0x32e   :  { %v486_v46 = vmul.f32 0.6931472, %v764_v44 }
 0x330   :  { %v489_v49 = vadd.f32 %v486_v46, %v473_v45 }
 0x331   :  { %v766_v51 = vpop.eup %765 }
 0x332   :  { %v493_v52 = vsub.f32 %v491_v50, %v489_v49  ;;  %v488_v54 = vmul.f32 0.6931472, %v766_v51 }
 0x334   :  { %v495_v57 = vmul.f32 2.0, %v493_v52  ;;  %v490_v38 = vadd.f32 %v488_v54, %v474_v53 }
 0x336   :  { %v497_v39 = vsub.f32 %v626_v55, %v495_v57  ;;  %v494_v59 = vsub.f32 %v492_v58, %v490_v38 }
 0x338   :  { %v500_v61 = vsel %vm499_vm8, %v497_v39, 0.0  ;;  %v496_v62 = vmul.f32 2.0, %v494_v59 }
 0x339   :  { %501 = vadd.xlane.f32.xlu0 %v500_v61 }
 0x33a   :  { %v498_v63 = vsub.f32 %v627_v60, %v496_v62 }
 0x33c   :  { %v503_v0 = vsel %vm499_vm8, %v498_v63, 0.0 }
 0x33d   :  { %504 = vadd.xlane.f32.xlu1 %v503_v0 }
 0x34e   :  { %573 = vrot.lane.b32.xlu1 %v647_v1, %s841_s22 }
 0x34f   :  { %571 = vrot.lane.b32.xlu0 %v646_v2, %s841_s22 }
 0x3c2   :  { %v502_v3 = vpop.xlane.xlu0 %501 }
 0x3c3   :  { %507 = vst.msk [vmem:[%s1021_s11] sm:$0xff] %vm506_vm9, %v502_v3 }
 0x3c6   :  { %v572_v4 = vpop.permute.xlu0 %571  ;;  %v505_v5 = vpop.xlane.xlu1 %504 }
 0x3c7   :  { %508 = vst.msk [vmem:[%s1021_s11 + $0x8] sm:$0xff] %vm506_vm9, %v505_v5 }
 0x3c8   :  { %578 = vst.msk [vmem:[#allocation7] sm:$0xf] %vm577_vm10, %v572_v4 }
 0x3ca   :  { %v574_v6 = vpop.permute.xlu1 %573 }
 0x3cb   :  { %579 = vst.msk [vmem:[#allocation7 + $0x4] sm:$0xf] %vm577_vm10, %v574_v6 }
 0x3cc   :  { %818 = shalt.err (!%p815_p0)
}
 0x3cd   :  { %591 = dma.vmem_to_hbm [thread:$0]  %s586_s26, 128, %s1020_s10, [#allocation4], %s834_s20, %s834_s20, %s835_s21  }
 0x3ce   :  { %831 = dma.done.wait [#allocation4], 128  }
 0x3cf   :  { %832 = vsyncadd [#allocation4], 4294967168 }
 0x3d0   :  { %599 = vsyncpa [#allocation3], 1 }
 0x3d1   :  { %600 = vsyncpa [#allocation6], 1 }
 0x3d2   :  { %601 = vsyncpa [#allocation4], 1 }

// kernel: tpu_custom_call.1
= control target key start
LH: loop header
LB: loop body
LE: loop exit
PB: predicated region body
PF: predicated region fallthrough
CT: control target
= control target key end

     0   :  { %17 = vsyncpa [#allocation3], 0  ;;  %s1010_s0 = inlined_call_operand.vmem [shape: bf16[16,16], index: 0, kind: input, shape index: {}]   ;;  %s1011_s1 = inlined_call_operand.vmem [shape: bf16[16,8], index: 1, kind: input, shape index: {}]   ;;  %s1012_s2 = inlined_call_operand.vmem [shape: f32[16,4], index: 2, kind: input, shape index: {}]   ;;  %s1013_s3 = inlined_call_operand.vmem [shape: bf16[16,128], index: 3, kind: input, shape index: {}]   ;;  %s1014_s4 = inlined_call_operand.vmem [shape: bf16[8,128], index: 4, kind: input, shape index: {}]   ;;  %s1015_s5 = inlined_call_operand.vmem [shape: f32[1,128], index: 5, kind: input, shape index: {}]   ;;  %s1016_s6 = inlined_call_operand.hbm [shape: bf16[128,128], index: 6, kind: input, shape index: {}]   ;;  %s1017_s7 = inlined_call_operand.vmem [shape: f32[1,128], index: 7, kind: input, shape index: {}]   ;;  %s1018_s8 = inlined_call_operand.hbm [shape: bf16[128,128], index: 8, kind: input, shape index: {}]   ;;  %s1019_s9 = inlined_call_operand.vmem [shape: f32[1,128], index: 9, kind: input, shape index: {}]   ;;  %s1020_s10 = inlined_call_operand.hbm [shape: bf16[16,20], index: 10, kind: output, shape index: {0}]   ;;  %s1021_s11 = inlined_call_operand.vmem [shape: f32[16,1], index: 11, kind: output, shape index: {1}]  }
   0x1   :  { %18 = vsyncpa [#allocation6], 0 }
   0x2   :  { %19 = vsyncpa [#allocation4], 0  ;;  %s833_s17 = smov [#allocation2]  }
   0x3   :  { %s37_s18 = sshll.u32 %s833_s17, 4  ;;  %s38_s18 = int_to_ptr.vmem [resolvable:$true] %s37_s18 }
   0x4   :  { %s775_s19 = scalar_lea.vmem %s38_s18, 1024  ;;  %p780_p1 = scmp.lt.s32.totalorder %s38_s18, %s38_s18 }
   0x5   :  { %p776_p0 = scmp.ne.s32.totalorder %s38_s18, %s775_s19  ;;  %p781_p2 = scmp.lt.s32.totalorder %s775_s19, %s775_s19 }
   0x7   :  { %p782_p3 = por %p781_p2, %p780_p1 }
   0x9   :  { %p783_p4 = pnand %p782_p3, %p776_p0 }
   0xb   :  { %786 = shalt.err (!%p783_p4)
}
   0xc   :  { %s834_s20 = smov 64   ;;  %s835_s21 = smov 4  }
   0xd   :  { %43 = dma.hbm_to_vmem [thread:$0]  %s1016_s6, 1024, %s38_s18, [#allocation3], %s834_s20, %s834_s20, %s835_s21  }
   0xe   :  { %s836_s24 = smov [#allocation5]  }
   0xf   :  { %s51_s25 = sshll.u32 %s836_s24, 4  ;;  %s52_s25 = int_to_ptr.vmem [resolvable:$true] %s51_s25 }
  0x10   :  { %s795_s26 = scalar_lea.vmem %s52_s25, 1024  ;;  %p800_p6 = scmp.lt.s32.totalorder %s52_s25, %s52_s25 }
  0x11   :  { %p796_p5 = scmp.ne.s32.totalorder %s52_s25, %s795_s26  ;;  %p801_p7 = scmp.lt.s32.totalorder %s795_s26, %s795_s26 }
  0x13   :  { %p802_p8 = por %p801_p7, %p800_p6 }
  0x15   :  { %p803_p9 = pnand %p802_p8, %p796_p5 }
  0x17   :  { %806 = shalt.err (!%p803_p9)
}
  0x18   :  { %57 = dma.hbm_to_vmem [thread:$0]  %s1018_s8, 1024, %s52_s25, [#allocation6], %s834_s20, %s834_s20, %s835_s21  }
  0x19   :  { %827 = dma.done.wait [#allocation3], 1024  }
  0x1a   :  { %828 = vsyncadd [#allocation3], 4294966272 }
  0x1b   :  { %829 = dma.done.wait [#allocation6], 1024  }
  0x1c   :  { %830 = vsyncadd [#allocation6], 4294966272  ;;  %v837_v0 = vmov 0.0   ;;  %vm838_vm0 = vmmov 0   ;;  %vm83_vm1 = vcmask 1043456   ;;  %v732_v3 = vld [vmem:[%s1013_s3] sm:$0xff]  }
  0x1d   :  { %670 = vmatprep.subr.bf16.mxu0 %v837_v0  ;;  %676 = vmatprep.subr.bf16.mxu1 %v837_v0  ;;  %v73_v1 = vld [vmem:[%s1014_s4] sm:$0xf]  ;;  %vm79_vm2 = vcmask 64512   ;;  %vm139_vm3 = vcmask 130048   ;;  %v735_v6 = vld [vmem:[#allocation2 + $0x38] sm:$0xff]   ;;  %v736_v7 = vld [vmem:[#allocation2 + $0x30] sm:$0xff]  }
  0x1e   :  { %672 = vmatprep.mubr.msk.bf16.mxu0 %vm838_vm0, %v837_v0  ;;  %678 = vmatprep.mubr.msk.bf16.mxu1 %vm838_vm0, %v837_v0  ;;  %v85_v2 = vsel %vm83_vm1, %v73_v1, 0  ;;  %v733_v4 = vld [vmem:[%s1011_s1] sm:$0xff]   ;;  %v737_v8 = vld [vmem:[#allocation2 + $0x28] sm:$0xff]   ;;  %v739_v10 = vld [vmem:[#allocation2 + $0x18] sm:$0xff]   ;;  %vm517_vm4 = vcmask 27648   ;;  %vm532_vm5 = vcmask 60448  }
  0x1f   :  { %671 = vmatpush3.bf16.msra.mxu0 %v85_v2  ;;  %677 = vmatpush3.bf16.msra.mxu1 %v732_v3  ;;  %v734_v5 = vld [vmem:[%s1010_s0] sm:$0xff]   ;;  %v740_v11 = vld [vmem:[#allocation2 + $0x10] sm:$0xff]   ;;  %v741_v12 = vld [vmem:[#allocation2 + $0x8] sm:$0xff]   ;;  %vm547_vm6 = vcmask 93248   ;;  %vm562_vm7 = vcmask 126048   ;;  %vm499_vm8 = vcmask 31744  }
  0x20   :  { %682 = vmatprep.subr.bf16.mxu0 %v837_v0  ;;  %702 = vmatprep.subr.bf16.mxu1 %v837_v0  ;;  %v738_v9 = vld [vmem:[#allocation2 + $0x20] sm:$0xff]   ;;  %v743_v14 = vld [vmem:[#allocation5 + $0x38] sm:$0xff]   ;;  %v744_v15 = vld [vmem:[#allocation5 + $0x30] sm:$0xff]   ;;  %s841_s22 = smov 16   ;;  %vm506_vm9 = vcmask 7168   ;;  %vm577_vm10 = vcmask 158848  }
  0x21   :  { %v742_v13 = vld [vmem:[#allocation2] sm:$0xff]   ;;  %v745_v16 = vld [vmem:[#allocation5 + $0x28] sm:$0xff]   ;;  %v747_v18 = vld [vmem:[#allocation5 + $0x18] sm:$0xff]   ;;  %s842_s25 = smov [#allocation7]  }
  0x22   :  { %673 = vmatmul.mubr.msk.bf16.vlgmr.msra.gmra.mxu0 %vm79_vm2, %v733_v4  ;;  %679 = vmatmul.mubr.msk.bf16.vlgmr.msra.gmra.mxu1 %vm139_vm3, %v734_v5  ;;  %v746_v17 = vld [vmem:[#allocation5 + $0x20] sm:$0xff]   ;;  %v748_v35 = vld [vmem:[#allocation5 + $0x10] sm:$0xff]   ;;  %v749_v36 = vld [vmem:[#allocation5 + $0x8] sm:$0xff]   ;;  %s585_s26 = sshll.u32 %s842_s25, 4  ;;  %s586_s26 = int_to_ptr.vmem [resolvable:$true] %s585_s26 }
  0x23   :  { %683 = vmatpush3.bf16.msra.mxu0 %v735_v6  ;;  %698 = vmatprep.mubr.msk.bf16.mxu0 %vm838_vm0, %v837_v0  ;;  %v607_v23 = vld [vmem:[%s1015_s5] ss:$0 sm:$0xff]  ;;  %v966_v39 = vld [vmem:[%s1012_s2 + $0x8] sm:$0xff]  ;;  %s807_s6 = scalar_lea.vmem %s586_s26, 128  ;;  %p812_p11 = scmp.lt.s32.totalorder %s586_s26, %s586_s26 }
  0x24   :  { %684 = vmatprep.subr.bf16.mxu0 %v837_v0  ;;  %718 = vmatprep.mubr.msk.bf16.mxu1 %vm838_vm0, %v837_v0  ;;  %v750_v37 = vld [vmem:[#allocation5] sm:$0xff]   ;;  %p808_p10 = scmp.ne.s32.totalorder %s586_s26, %s807_s6  ;;  %p813_p12 = scmp.lt.s32.totalorder %s807_s6, %s807_s6 }
  0x25   :  { %703 = vmatpush3.bf16.msra.mxu1 %v743_v14  ;;  %v959_v38 = vld [vmem:[%s1012_s2] sm:$0xff] }
  0x26   :  { %704 = vmatprep.subr.bf16.mxu1 %v837_v0  ;;  %435 = vrot.lane.b32.xlu0 %v959_v38, %s835_s21  ;;  %v608_v40 = vld [vmem:[%s1017_s7] ss:$0 sm:$0xff]  ;;  %s839_s7 = smov 124   ;;  %p814_p13 = por %p813_p12, %p812_p11 }
  0x27   :  { %685 = vmatpush3.bf16.msra.mxu0 %v736_v7  ;;  %v617_v50 = vld [vmem:[%s1019_s9] ss:$0 sm:$0xff]  ;;  %s840_s9 = smov 8  }
  0x28   :  { %686 = vmatprep.subr.bf16.mxu0 %v837_v0  ;;  %p815_p0 = pnand %p814_p13, %p808_p10 }
  0x29   :  { %705 = vmatpush3.bf16.msra.mxu1 %v744_v15 }
  0x2a   :  { %706 = vmatprep.subr.bf16.mxu1 %v837_v0  ;;  %437 = vrot.lane.b32.xlu0 %v966_v39, %s835_s21 }
  0x2b   :  { %687 = vmatpush3.bf16.msra.mxu0 %v737_v8 }
  0x2c   :  { %688 = vmatprep.subr.bf16.mxu0 %v837_v0 }
  0x2d   :  { %707 = vmatpush3.bf16.msra.mxu1 %v745_v16 }
  0x2e   :  { %708 = vmatprep.subr.bf16.mxu1 %v837_v0 }
  0x2f   :  { %689 = vmatpush3.bf16.msra.mxu0 %v738_v9 }
  0x30   :  { %690 = vmatprep.subr.bf16.mxu0 %v837_v0 }
  0x31   :  { %709 = vmatpush3.bf16.msra.mxu1 %v746_v17 }
  0x32   :  { %710 = vmatprep.subr.bf16.mxu1 %v837_v0 }
  0x33   :  { %691 = vmatpush3.bf16.msra.mxu0 %v739_v10 }
  0x34   :  { %692 = vmatprep.subr.bf16.mxu0 %v837_v0 }
  0x35   :  { %711 = vmatpush3.bf16.msra.mxu1 %v747_v18 }
  0x36   :  { %712 = vmatprep.subr.bf16.mxu1 %v837_v0 }
  0x37   :  { %693 = vmatpush3.bf16.msra.mxu0 %v740_v11 }
  0x38   :  { %694 = vmatprep.subr.bf16.mxu0 %v837_v0 }
  0x39   :  { %713 = vmatpush3.bf16.msra.mxu1 %v748_v35 }
  0x3a   :  { %714 = vmatprep.subr.bf16.mxu1 %v837_v0 }
  0x3b   :  { %695 = vmatpush3.bf16.msra.mxu0 %v741_v12 }
  0x3c   :  { %696 = vmatprep.subr.bf16.mxu0 %v837_v0 }
  0x3d   :  { %715 = vmatpush3.bf16.msra.mxu1 %v749_v36 }
  0x3e   :  { %716 = vmatprep.subr.bf16.mxu1 %v837_v0 }
  0x3f   :  { %697 = vmatpush3.bf16.msra.mxu0 %v742_v13 }
  0x41   :  { %717 = vmatpush3.bf16.msra.mxu1 %v750_v37 }
  0x98   :  { %v436_v1 = vpop.permute.xlu0 %435 }
  0x9c   :  { %v438_v5 = vpop.permute.xlu0 %437 }
  0xe2   :  { %v121_v19 = vpop.f32.mrf.mxu0  ;;  %v177_v20 = vpop.f32.mrf.mxu1 }
  0xe3   :  { %v178_v21 = vadd.f32 %v177_v20, %v121_v19 }
  0xe4   :  { %v674_v22 = vpop.f32.mrf.mxu0  ;;  %v680_v24 = vpop.f32.mrf.mxu1 }
  0xe5   :  { %v191_v27 = vadd.f32 %v607_v23, %v178_v21 }
  0xe6   :  { %v124_v25 = vpop.f32.mrf.mxu0  ;;  %v180_v26 = vpop.f32.mrf.mxu1 }
  0xe7   :  { %v181_v28 = vadd.f32 %v180_v26, %v124_v25  ;;  %v193_v32 = vmax.f32 %v191_v27, 0.0 }
  0xe8   :  { %v675_v29 = vpop.f32.mrf.mxu0  ;;  %v681_v30 = vpop.f32.mrf.mxu1 }
  0xe9   :  { %v192_v31 = vadd.f32 %v607_v23, %v181_v28 }
  0xeb   :  { %v194_v33 = vmax.f32 %v192_v31, 0.0 }
  0xed   :  { %v195_v34 = vpack.c.bf16 %v194_v33, %v193_v32 }
  0xef   :  { %699 = vmatmul.mubr.bf16.vlgmr.msra.gmra.mxu0 %v195_v34 }
 0x1af   :  { %v301_v41 = vpop.f32.mrf.mxu0 }
 0x1b0   :  { %v302_v43 = vadd.f32 %v608_v40, %v301_v41  ;;  %v455_v41 = vmul.f32 %v959_v38, %v959_v38 }
 0x1b1   :  { %v700_v42 = vpop.f32.mrf.mxu0 }
 0x1b2   :  { %v308_v47 = vmax.f32 %v302_v43, 0.0  ;;  %v457_v42 = vmul.f32 -0.5, %v455_v41  ;;  %v456_v43 = vmul.f32 %v966_v39, %v966_v39 }
 0x1b3   :  { %v304_v44 = vpop.f32.mrf.mxu0 }
 0x1b4   :  { %v305_v45 = vadd.f32 %v608_v40, %v304_v44 }
 0x1b5   :  { %v701_v46 = vpop.f32.mrf.mxu0 }
 0x1b6   :  { %v309_v48 = vmax.f32 %v305_v45, 0.0 }
 0x1b8   :  { %v310_v49 = vpack.c.bf16 %v309_v48, %v308_v47  ;;  %v458_v48 = vmul.f32 -0.5, %v456_v43 }
 0x1ba   :  { %719 = vmatmul.mubr.bf16.vlgmr.msra.gmra.mxu1 %v310_v49 }
 0x27a   :  { %v416_v51 = vpop.f32.mrf.mxu1 }
 0x27b   :  { %v417_v52 = vadd.f32 %v617_v50, %v416_v51 }
 0x27c   :  { %v720_v53 = vpop.f32.mrf.mxu1 }
 0x27d   :  { %v425_v54 = vmax.f32 %v417_v52, -20.0  ;;  %v640_v62 = vpack.c.bf16 %v417_v52, %v417_v52 }
 0x27e   :  { %v419_v55 = vpop.f32.mrf.mxu1 }
 0x27f   :  { %v420_v56 = vadd.f32 %v617_v50, %v419_v55  ;;  %v427_v57 = vmin.f32 %v425_v54, 2.0 }
 0x280   :  { %v721_v58 = vpop.f32.mrf.mxu1 }
 0x281   :  { %v426_v59 = vmax.f32 %v420_v56, -20.0  ;;  %461 = vrot.lane.b32.xlu0 %v427_v57, %s839_s7  ;;  %v429_v60 = vmul.f32 1.442695, %v427_v57  ;;  %v642_v0 = vpack.c.bf16 %v427_v57, %v427_v57  ;;  %v641_v8 = vpack.c.bf16 %v420_v56, %v420_v56 }
 0x283   :  { %v428_v61 = vmin.f32 %v426_v59, 2.0  ;;  %751 = vpow2.f32 %v429_v60 }
 0x285   :  { %v431_v63 = vmul.f32 1.442695, %v428_v61  ;;  %526 = vrot.lane.b32.xlu0 %v640_v62, %s835_s21  ;;  %v643_v9 = vpack.c.bf16 %v428_v61, %v428_v61 }
 0x287   :  { %753 = vpow2.f32 %v431_v63 }
 0x289   :  { %541 = vrot.lane.b32.xlu0 %v642_v0, %s835_s21 }
 0x290   :  { %v752_v2 = vpop.eup %751 }
 0x291   :  { %v441_v3 = vmul.f32 %v752_v2, %v436_v1  ;;  %v644_v4 = vpack.c.bf16 %v752_v2, %v752_v2 }
 0x293   :  { %556 = vrot.lane.b32.xlu0 %v644_v4, %s840_s9  ;;  %445 = vrot.lane.b32.xlu1 %v441_v3, %s839_s7 }
 0x294   :  { %v754_v6 = vpop.eup %753 }
 0x295   :  { %v442_v7 = vmul.f32 %v754_v6, %v438_v5  ;;  %v645_v10 = vpack.c.bf16 %v754_v6, %v754_v6 }
 0x297   :  { %447 = vrot.lane.b32.xlu1 %v442_v7, %s839_s7 }
 0x29b   :  { %463 = vrot.lane.b32.xlu1 %v428_v61, %s839_s7 }
 0x29f   :  { %528 = vrot.lane.b32.xlu1 %v641_v8, %s835_s21 }
 0x2a3   :  { %543 = vrot.lane.b32.xlu1 %v643_v9, %s835_s21 }
 0x2a7   :  { %558 = vrot.lane.b32.xlu1 %v645_v10, %s840_s9 }
 0x2f3   :  { %v462_v15 = vpop.permute.xlu0 %461 }
 0x2f4   :  { %v467_v47 = vsub.f32 %v457_v42, %v462_v15 }
 0x2f6   :  { %v626_v55 = vadd.f32 -0.9189385, %v467_v47 }
 0x2f7   :  { %v527_v23 = vpop.permute.xlu0 %526 }
 0x2fb   :  { %v542_v28 = vpop.permute.xlu0 %541 }
 0x305   :  { %v446_v11 = vpop.permute.xlu1 %445  ;;  %v557_v32 = vpop.permute.xlu0 %556 }
 0x306   :  { %v980_v12 = vadd.f32 %v446_v11, %v417_v52 }
 0x308   :  { %755 = vtanh.f32 %v980_v12  ;;  %v471_v13 = vmul.f32 -2.0, %v980_v12  ;;  %v491_v50 = vsub.f32 0.6931472, %v980_v12  ;;  %v646_v2 = vpack.c.bf16 %v980_v12, %v980_v12 }
 0x309   :  { %v448_v14 = vpop.permute.xlu1 %447 }
 0x30a   :  { %v475_v16 = vand.u32 2147483647, %v471_v13  ;;  %v984_v17 = vadd.f32 %v448_v14, %v420_v56  ;;  %v473_v45 = vmax.f32 %v471_v13, 0.0 }
 0x30c   :  { %v477_v18 = vsub.f32 0.0, %v475_v16  ;;  %757 = vtanh.f32 %v984_v17  ;;  %v472_v19 = vmul.f32 -2.0, %v984_v17  ;;  %v492_v58 = vsub.f32 0.6931472, %v984_v17 }
 0x30d   :  { %v464_v20 = vpop.permute.xlu1 %463  ;;  %v647_v1 = vpack.c.bf16 %v984_v17, %v984_v17 }
 0x30e   :  { %v479_v21 = vmul.f32 1.442695, %v477_v18  ;;  %v476_v22 = vand.u32 2147483647, %v472_v19  ;;  %v474_v53 = vmax.f32 %v472_v19, 0.0  ;;  %v468_v56 = vsub.f32 %v458_v48, %v464_v20 }
 0x310   :  { %759 = vpow2.f32 %v479_v21  ;;  %v478_v24 = vsub.f32 0.0, %v476_v22  ;;  %v627_v60 = vadd.f32 -0.9189385, %v468_v56 }
 0x311   :  { %v529_v26 = vpop.permute.xlu1 %528 }
 0x312   :  { %v481_v25 = vmul.f32 1.442695, %v478_v24 }
 0x314   :  { %761 = vpow2.f32 %v481_v25 }
 0x315   :  { %v756_v27 = vpop.eup %755  ;;  %v544_v30 = vpop.permute.xlu1 %543 }
 0x316   :  { %v638_v29 = vpack.c.bf16 %v756_v27, %v756_v27 }
 0x318   :  { %518 = vst.msk [vmem:[#allocation7] sm:$0xf] %vm517_vm4, %v638_v29 }
 0x319   :  { %v758_v31 = vpop.eup %757  ;;  %533 = vst.msk [vmem:[#allocation7] sm:$0xf] %vm532_vm5, %v527_v23  ;;  %v559_v35 = vpop.permute.xlu1 %558 }
 0x31a   :  { %v639_v33 = vpack.c.bf16 %v758_v31, %v758_v31  ;;  %548 = vst.msk [vmem:[#allocation7] sm:$0xf] %vm547_vm6, %v542_v28 }
 0x31b   :  { %563 = vst.msk [vmem:[#allocation7] sm:$0xf] %vm562_vm7, %v557_v32 }
 0x31c   :  { %519 = vst.msk [vmem:[#allocation7 + $0x4] sm:$0xf] %vm517_vm4, %v639_v33 }
 0x31d   :  { %v760_v34 = vpop.eup %759  ;;  %534 = vst.msk [vmem:[#allocation7 + $0x4] sm:$0xf] %vm532_vm5, %v529_v26 }
 0x31e   :  { %549 = vst.msk [vmem:[#allocation7 + $0x4] sm:$0xf] %vm547_vm6, %v544_v30  ;;  %v483_v36 = vadd.f32 1.0, %v760_v34 }
 0x31f   :  { %564 = vst.msk [vmem:[#allocation7 + $0x4] sm:$0xf] %vm562_vm7, %v559_v35 }
 0x320   :  { %763 = vlog2.f32 %v483_v36 }
 0x321   :  { %v762_v37 = vpop.eup %761 }
 0x322   :  { %v484_v40 = vadd.f32 1.0, %v762_v37 }
 0x324   :  { %765 = vlog2.f32 %v484_v40 }
 0x32d   :  { %v764_v44 = vpop.eup %763 }
 0x32e   :  { %v486_v46 = vmul.f32 0.6931472, %v764_v44 }
 0x330   :  { %v489_v49 = vadd.f32 %v486_v46, %v473_v45 }
 0x331   :  { %v766_v51 = vpop.eup %765 }
 0x332   :  { %v493_v52 = vsub.f32 %v491_v50, %v489_v49  ;;  %v488_v54 = vmul.f32 0.6931472, %v766_v51 }
 0x334   :  { %v495_v57 = vmul.f32 2.0, %v493_v52  ;;  %v490_v38 = vadd.f32 %v488_v54, %v474_v53 }
 0x336   :  { %v497_v39 = vsub.f32 %v626_v55, %v495_v57  ;;  %v494_v59 = vsub.f32 %v492_v58, %v490_v38 }
 0x338   :  { %v500_v61 = vsel %vm499_vm8, %v497_v39, 0.0  ;;  %v496_v62 = vmul.f32 2.0, %v494_v59 }
 0x339   :  { %501 = vadd.xlane.f32.xlu0 %v500_v61 }
 0x33a   :  { %v498_v63 = vsub.f32 %v627_v60, %v496_v62 }
 0x33c   :  { %v503_v0 = vsel %vm499_vm8, %v498_v63, 0.0 }
 0x33d   :  { %504 = vadd.xlane.f32.xlu1 %v503_v0 }
 0x34e   :  { %573 = vrot.lane.b32.xlu1 %v647_v1, %s841_s22 }
 0x34f   :  { %571 = vrot.lane.b32.xlu0 %v646_v2, %s841_s22 }
 0x3c2   :  { %v502_v3 = vpop.xlane.xlu0 %501 }
 0x3c3   :  { %507 = vst.msk [vmem:[%s1021_s11] sm:$0xff] %vm506_vm9, %v502_v3 }
 0x3c6   :  { %v572_v4 = vpop.permute.xlu0 %571  ;;  %v505_v5 = vpop.xlane.xlu1 %504 }
 0x3c7   :  { %508 = vst.msk [vmem:[%s1021_s11 + $0x8] sm:$0xff] %vm506_vm9, %v505_v5 }
 0x3c8   :  { %578 = vst.msk [vmem:[#allocation7] sm:$0xf] %vm577_vm10, %v572_v4 }
 0x3ca   :  { %v574_v6 = vpop.permute.xlu1 %573 }
 0x3cb   :  { %579 = vst.msk [vmem:[#allocation7 + $0x4] sm:$0xf] %vm577_vm10, %v574_v6 }
 0x3cc   :  { %818 = shalt.err (!%p815_p0)
}
 0x3cd   :  { %591 = dma.vmem_to_hbm [thread:$0]  %s586_s26, 128, %s1020_s10, [#allocation4], %s834_s20, %s834_s20, %s835_s21  }
 0x3ce   :  { %831 = dma.done.wait [#allocation4], 128  }
 0x3cf   :  { %832 = vsyncadd [#allocation4], 4294967168 }
 0x3d0   :  { %599 = vsyncpa [#allocation3], 1 }
 0x3d1   :  { %600 = vsyncpa [#allocation6], 1 }
 0x3d2   :  { %601 = vsyncpa [#allocation4], 1 }

</bundles_post_ra>
